<compile_context>
chip_gen: v7x
topology: tpu7x:2x2x1
jax: 0.10.0
libtpu: 0.0.40
codegen_flags: <defaults>
</compile_context>

<pallas_src>
import functools

import jax
import jax.numpy as jnp
from jax import lax
from jax.experimental import pallas as pl
from jax.experimental.pallas import tpu as pltpu


# ----------------------------------------------------------------------------
# Fused Pallas kernel: all URGCN layers in one pallas_call.
# grid = (num_layer, num_edge_tiles)
# ----------------------------------------------------------------------------
def _urgcn_fused_kernel(
    h0_hbm,                                   # (N, D) f32, memory_space=ANY
    relemb_ref, wboth_ref, invdeg_ref,        # VMEM inputs
    src_ref, rel_ref, dst_ref,                # VMEM int32 edge-index blocks
    out_ref,                                  # (N, D) f32, resident; node-state carry
    hw_s, rw_s, acc, h0_sem,                  # scratch
    *, active,
):
  f32 = jnp.float32
  layer = pl.program_id(0)
  et = pl.program_id(1)
  n_et = pl.num_programs(1)

  d = hw_s.shape[1]
  n_nodes = hw_s.shape[0]
  n_rel = rw_s.shape[0]
  tile_e = src_ref.shape[0]

  # Bring the initial node features into the resident output buffer once.
  @pl.when((layer == 0) & (et == 0))
  def _():
    cp = pltpu.make_async_copy(h0_hbm, out_ref, h0_sem.at[0])
    cp.start()
    cp.wait()

  # Per-layer setup: one 256-wide fused matmul produces hW and the self-loop
  # term together; the self-loop term seeds the accumulator (off the finalize
  # critical path).  rW is a tiny (R,D) matmul.
  @pl.when(et == 0)
  def _():
    w_both = wboth_ref[...]                              # (D, 2D) bf16/f32
    h_op = out_ref[...].astype(w_both.dtype)             # single cast, reused
    res = jnp.dot(h_op, w_both, preferred_element_type=f32)   # (N, 2D) f32
    hw_s[...] = res[:, :d]                               # h @ W_neighbor
    acc[...] = res[:, d:]                                # h @ W_loop  (seed)
    rw_s[...] = jnp.dot(relemb_ref[...], w_both[:, :d],
                        preferred_element_type=f32)      # (R, D) f32

  # --- Edge tile: MXU one-hot gather + scatter (no per-edge loop) -----------
  src_v = src_ref[...]                                   # (tile_e, 1) int32
  rel_v = rel_ref[...]                                   # (tile_e, 1) int32
  dst_v = dst_ref[...]                                   # (1, tile_e) int32

  src_oh = (src_v == lax.broadcasted_iota(
      jnp.int32, (tile_e, n_nodes), 1)).astype(f32)      # (tile_e, N)
  rel_oh = (rel_v == lax.broadcasted_iota(
      jnp.int32, (tile_e, n_rel), 1)).astype(f32)        # (tile_e, R)

  msg = (jnp.dot(src_oh, hw_s[...], preferred_element_type=f32) +
         jnp.dot(rel_oh, rw_s[...], preferred_element_type=f32))   # (tile_e, D)

  # Scatter-add with 1/in-degree folded into the one-hot rows (mean for free).
  # Padded edges carry dst == N -> all-zero column -> contribute nothing.
  dst_eq = (dst_v == lax.broadcasted_iota(
      jnp.int32, (n_nodes, tile_e), 0))                  # (N, tile_e) bool
  dst_oh = jnp.where(dst_eq, invdeg_ref[...], 0.0)       # (N, tile_e) f32
  acc[...] += jnp.dot(dst_oh, msg, preferred_element_type=f32)

  # Layer finalize: activation; out_ref doubles as the node-state carry.
  @pl.when(et == n_et - 1)
  def _():
    out = acc[...]
    if active:
      # F.rrelu eval-mode semantics: negative slope = (1/8 + 1/3) / 2.
      # TODO(synk): training-mode rrelu samples the slope per element.
      slope = (1.0 / 8.0 + 1.0 / 3.0) / 2.0
      out = jnp.where(out >= 0.0, out, slope * out)
    out_ref[...] = out


def _round_up(x, m):
  return ((x + m - 1) // m) * m


def _pick_vmem_limit():
  """Per-generation VMEM scoped limit (<= ~85% of physical; fallback 48 MiB)."""
  try:
    info = pltpu.get_tpu_info()
    cap = getattr(info, "vmem_capacity_bytes", None)
    if cap:
      return int(max(32 * 2**20, min(int(cap * 0.85), 110 * 2**20)))
  except Exception:
    pass
  return 48 * 2**20


def urgcn_forward(input_h, relation_embed, edges, w_nb_stack, w_loop_stack,
                  *, active=False, use_bf16=True, tile_e_max=2048):
  """Runs the full URGCN stack in a single fused Pallas call."""
  N, D = input_h.shape
  R = relation_embed.shape[0]
  E = edges.shape[0]
  L = w_nb_stack.shape[0]

  src = edges[:, 0].astype(jnp.int32)
  rel = edges[:, 1].astype(jnp.int32)
  dst = edges[:, 2].astype(jnp.int32)

  # In-degree normalization (depends only on dst): exact divide, computed once.
  deg = jnp.zeros((N,), jnp.float32).at[dst].add(1.0)
  inv_deg = (1.0 / jnp.maximum(deg, 1.0)).reshape(N, 1)

  # Edge tiling: pad E to a multiple of tile_e; padded edges point at the
  # out-of-range node N so their dst one-hot column is all zeros.
  tile_e = int(min(tile_e_max, _round_up(E, 128)))
  e_pad = _round_up(E, tile_e)
  pad = e_pad - E
  if pad:
    src = jnp.concatenate([src, jnp.zeros((pad,), jnp.int32)])
    rel = jnp.concatenate([rel, jnp.zeros((pad,), jnp.int32)])
    dst = jnp.concatenate([dst, jnp.full((pad,), N, jnp.int32)])
  src2 = src.reshape(e_pad, 1)        # sublane-major for (tile_e, N) one-hot
  rel2 = rel.reshape(e_pad, 1)
  dst2 = dst.reshape(1, e_pad)        # lane-major for (N, tile_e) one-hot
  num_e_tiles = e_pad // tile_e

  # bf16 MXU operands, f32 accumulation.  W_neighbor and W_loop fused -> (D,2D).
  op_dtype = jnp.bfloat16 if use_bf16 else jnp.float32
  relemb = relation_embed.astype(op_dtype)
  w_both = jnp.concatenate([w_nb_stack, w_loop_stack], axis=2).astype(op_dtype)

  kernel = functools.partial(_urgcn_fused_kernel, active=active)

  grid_spec = pltpu.PrefetchScalarGridSpec(
      num_scalar_prefetch=0,
      grid=(L, num_e_tiles),
      in_specs=[
          pl.BlockSpec(memory_space=pl.ANY),                          # h0 (HBM)
          pl.BlockSpec((R, D), lambda l, t: (0, 0)),                  # rel_emb
          pl.BlockSpec((None, D, 2 * D), lambda l, t: (l, 0, 0)),     # [W_nb|W_loop][l]
          pl.BlockSpec((N, 1), lambda l, t: (0, 0)),                  # 1/deg
          pl.BlockSpec((tile_e, 1), lambda l, t: (t, 0)),             # src
          pl.BlockSpec((tile_e, 1), lambda l, t: (t, 0)),             # rel
          pl.BlockSpec((1, tile_e), lambda l, t: (0, t)),             # dst
      ],
      out_specs=pl.BlockSpec((N, D), lambda l, t: (0, 0)),            # resident carry
      scratch_shapes=[
          pltpu.VMEM((N, D), jnp.float32),     # hW = h @ W_neighbor
          pltpu.VMEM((R, D), jnp.float32),     # rW = rel_emb @ W_neighbor
          pltpu.VMEM((N, D), jnp.float32),     # accumulator (seeded w/ self term)
          pltpu.SemaphoreType.DMA((1,)),       # h0 load semaphore
      ],
  )

  return pl.pallas_call(
      kernel,
      out_shape=jax.ShapeDtypeStruct((N, D), jnp.float32),
      grid_spec=grid_spec,
      compiler_params=pltpu.CompilerParams(
          # layer axis carries state; edge axis is a reduction into acc.
          dimension_semantics=("arbitrary", "arbitrary"),
          vmem_limit_bytes=_pick_vmem_limit(),
      ),
  )(input_h.astype(jnp.float32), relemb, w_both, inv_deg, src2, rel2, dst2)


# ----------------------------------------------------------------------------
# URGCNBase: stack of num_layer URGCN layers
# ----------------------------------------------------------------------------
class URGCNBase:

  def __init__(self, dim, num_layer=1, active=False, dropout=0.0,
               self_loop=True, key=None, use_bf16=True):
    assert self_loop, "this implementation assumes self_loop=True"
    # TODO(synk): dropout > 0 would need pltpu.prng_* in-kernel RNG; p=0 here.
    assert dropout == 0.0, "dropout > 0 not implemented"
    self.dim = dim
    self.num_layer = num_layer
    self.active = active
    self.use_bf16 = use_bf16
    if key is None:
      key = jax.random.PRNGKey(0)
    k1, k2 = jax.random.split(key)
    bound = (6.0 / (dim + dim)) ** 0.5   # xavier_uniform-style, deterministic
    self.w_nb = jax.random.uniform(k1, (num_layer, dim, dim), jnp.float32,
                                   -bound, bound)
    self.w_loop = jax.random.uniform(k2, (num_layer, dim, dim), jnp.float32,
                                     -bound, bound)

  def forward(self, input_h, relation_embed, edges, training=True):
    del training  # rrelu uses eval-mode slope; dropout p=0.0
    return urgcn_forward(input_h, relation_embed, edges, self.w_nb,
                         self.w_loop, active=self.active,
                         use_bf16=self.use_bf16)

  __call__ = forward


# ----------------------------------------------------------------------------
# Pure-JAX reference (mirrors the bf16-operand / f32-accumulate math)
# ----------------------------------------------------------------------------
def _reference_forward(model, input_h, relation_embed, edges):
  src, rel, dst = edges[:, 0], edges[:, 1], edges[:, 2]
  N, D = input_h.shape
  op_dtype = jnp.bfloat16 if model.use_bf16 else jnp.float32
  rel_emb = relation_embed.astype(op_dtype)
  deg = jnp.zeros((N,), jnp.float32).at[dst].add(1.0)
  inv_deg = 1.0 / jnp.maximum(deg, 1.0)
  h = input_h.astype(jnp.float32)
  for i in range(model.num_layer):
    wnb = model.w_nb[i].astype(op_dtype)
    wlp = model.w_loop[i].astype(op_dtype)
    hw = jnp.dot(h.astype(op_dtype), wnb, preferred_element_type=jnp.float32)
    rw = jnp.dot(rel_emb, wnb, preferred_element_type=jnp.float32)
    msg = hw[src] + rw[rel]
    agg = jnp.zeros((N, D), jnp.float32).at[dst].add(msg)
    out = agg * inv_deg[:, None] + jnp.dot(
        h.astype(op_dtype), wlp, preferred_element_type=jnp.float32)
    if model.active:
      slope = (1.0 / 8.0 + 1.0 / 3.0) / 2.0
      out = jnp.where(out >= 0.0, out, slope * out)
    h = out
  return h


if __name__ == "__main__":
  key = jax.random.PRNGKey(0)
  # nodes, hidden (lane-aligned), relations, edges
  N, D, R, E = 128, 128, 16, 512

  k_h, k_r, k_s, k_rel, k_d, k_p = jax.random.split(key, 6)
  input_h = jax.random.normal(k_h, (N, D), jnp.float32)
  relation_embed = jax.random.normal(k_r, (R, D), jnp.float32)
  src = jax.random.randint(k_s, (E,), 0, N, jnp.int32)
  rel = jax.random.randint(k_rel, (E,), 0, R, jnp.int32)
  dst = jax.random.randint(k_d, (E,), 0, N, jnp.int32)
  edges = jnp.stack([src, rel, dst], axis=1)           # (E, 3)

  model = URGCNBase(dim=D, num_layer=2, active=True, dropout=0.0,
                    self_loop=True, key=k_p)

  out = jax.block_until_ready(model(input_h, relation_embed, edges,
                                    training=True))
  ref = jax.block_until_ready(
      _reference_forward(model, input_h, relation_embed, edges))

  assert out.shape == (N, D)
  max_err = float(jnp.max(jnp.abs(out - ref)))
  assert jnp.allclose(out, ref, rtol=5e-3, atol=5e-3), (
      f"mismatch vs reference (max abs err {max_err})")

  print("KERNEL_OK")
</pallas_src>

<mosaic_0001>
module attributes {stable_mosaic.version = 11 : i64} {
  func.func @_urgcn_fused_kernel(%arg0: i32, %arg1: i32, %arg2: memref<128x128xf32, #tpu.memory_space<any>>, %arg3: memref<16x128xbf16, #tpu.memory_space<vmem>>, %arg4: memref<1x128x256xbf16, #tpu.memory_space<vmem>>, %arg5: memref<128x1xf32, #tpu.memory_space<vmem>>, %arg6: memref<512x1xi32, #tpu.memory_space<vmem>>, %arg7: memref<512x1xi32, #tpu.memory_space<vmem>>, %arg8: memref<1x512xi32, #tpu.memory_space<vmem>>, %arg9: memref<128x128xf32, #tpu.memory_space<vmem>>, %arg10: memref<128x128xf32, #tpu.memory_space<vmem>>, %arg11: memref<16x128xf32, #tpu.memory_space<vmem>>, %arg12: memref<128x128xf32, #tpu.memory_space<vmem>>, %arg13: memref<1x!tpu.dma_semaphore, #tpu.memory_space<semaphore_mem>>) attributes {dimension_semantics = [#tpu.dimension_semantics<arbitrary>, #tpu.dimension_semantics<arbitrary>], iteration_bounds = array<i64: 2, 1>, scalar_prefetch = 0 : i64, scratch_operands = 4 : i64, tpu.core_type = #tpu.core_type<tc>, window_params = [{}, {pipeline_mode = #tpu.pipeline_mode<synchronous>, transform_indices = @transform_1, window_bounds = array<i64: 16, 128>}, {transform_indices = @transform_2, window_bounds = array<i64: 1, 128, 256>}, {pipeline_mode = #tpu.pipeline_mode<synchronous>, transform_indices = @transform_3, window_bounds = array<i64: 128, 1>}, {transform_indices = @transform_4, window_bounds = array<i64: 512, 1>}, {transform_indices = @transform_5, window_bounds = array<i64: 512, 1>}, {transform_indices = @transform_6, window_bounds = array<i64: 1, 512>}, {pipeline_mode = #tpu.pipeline_mode<synchronous>, transform_indices = @transform_7, window_bounds = array<i64: 128, 128>}]} {
    %c0_i32 = arith.constant 0 : i32
    %0 = arith.cmpi eq, %arg0, %c0_i32 : i32
    %c0_i32_0 = arith.constant 0 : i32
    %1 = arith.cmpi eq, %arg1, %c0_i32_0 : i32
    %2 = arith.andi %0, %1 : i1
    %3 = arith.extui %2 : i1 to i32
    %c0_i32_1 = arith.constant 0 : i32
    %4 = arith.cmpi ne, %3, %c0_i32_1 : i32
    scf.if %4 {
      %c0_i32_24 = arith.constant 0 : i32
      %41 = tpu.memref_slice %arg13[%c0_i32_24] : memref<1x!tpu.dma_semaphore, #tpu.memory_space<semaphore_mem>> -> memref<1x!tpu.dma_semaphore, #tpu.memory_space<semaphore_mem>>
      %42 = tpu.memref_squeeze %41 : memref<1x!tpu.dma_semaphore, #tpu.memory_space<semaphore_mem>> -> memref<!tpu.dma_semaphore, #tpu.memory_space<semaphore_mem>>
      tpu.enqueue_dma source(%arg2 : memref<128x128xf32, #tpu.memory_space<any>>) target(%arg9 : memref<128x128xf32, #tpu.memory_space<vmem>>) target_semaphore(%42 : memref<!tpu.dma_semaphore, #tpu.memory_space<semaphore_mem>>)
      %c0_i32_25 = arith.constant 0 : i32
      %43 = tpu.memref_slice %arg13[%c0_i32_25] : memref<1x!tpu.dma_semaphore, #tpu.memory_space<semaphore_mem>> -> memref<1x!tpu.dma_semaphore, #tpu.memory_space<semaphore_mem>>
      %44 = tpu.memref_squeeze %43 : memref<1x!tpu.dma_semaphore, #tpu.memory_space<semaphore_mem>> -> memref<!tpu.dma_semaphore, #tpu.memory_space<semaphore_mem>>
      tpu.wait_dma2 semaphore(%44 : memref<!tpu.dma_semaphore, #tpu.memory_space<semaphore_mem>>) src(%arg2 : memref<128x128xf32, #tpu.memory_space<any>>) dst(%arg9 : memref<128x128xf32, #tpu.memory_space<vmem>>)
    } else {
    }
    %c0_i32_2 = arith.constant 0 : i32
    %5 = arith.cmpi eq, %arg1, %c0_i32_2 : i32
    %6 = arith.extui %5 : i1 to i32
    %c0_i32_3 = arith.constant 0 : i32
    %7 = arith.cmpi ne, %6, %c0_i32_3 : i32
    scf.if %7 {
      %c0_24 = arith.constant 0 : index
      %c0_25 = arith.constant 0 : index
      %c0_26 = arith.constant 0 : index
      %41 = vector.load %arg4[%c0_24, %c0_25, %c0_26] : memref<1x128x256xbf16, #tpu.memory_space<vmem>>, vector<1x128x256xbf16>
      %42 = vector.shape_cast %41 : vector<1x128x256xbf16> to vector<128x256xbf16>
      %c0_27 = arith.constant 0 : index
      %c0_28 = arith.constant 0 : index
      %43 = vector.load %arg9[%c0_27, %c0_28] : memref<128x128xf32, #tpu.memory_space<vmem>>, vector<128x128xf32>
      %44 = arith.truncf %43 : vector<128x128xf32> to vector<128x128xbf16>
      %cst_29 = arith.constant dense<0.000000e+00> : vector<128x256xf32>
      %45 = tpu.matmul %44, %42, %cst_29 {dimension_numbers = #tpu.dot_dimension_numbers<[1], [0], [0], [1], [0, 0, 1, 1], [], []>} : vector<128x128xbf16>, vector<128x256xbf16>, vector<128x256xf32> -> vector<128x256xf32>
      %46 = vector.extract_strided_slice %45 {offsets = [0, 0], sizes = [128, 128], strides = [1, 1]} : vector<128x256xf32> to vector<128x128xf32>
      %c0_30 = arith.constant 0 : index
      %c0_31 = arith.constant 0 : index
      %47 = vector.load %arg10[%c0_30, %c0_31] : memref<128x128xf32, #tpu.memory_space<vmem>>, vector<128x128xf32>
      tpu.vector_store %arg10[%c0_30, %c0_31], %46 {strides = array<i32>} : memref<128x128xf32, #tpu.memory_space<vmem>>, vector<128x128xf32>,
      %48 = vector.extract_strided_slice %45 {offsets = [0, 128], sizes = [128, 128], strides = [1, 1]} : vector<128x256xf32> to vector<128x128xf32>
      %c0_32 = arith.constant 0 : index
      %c0_33 = arith.constant 0 : index
      %49 = vector.load %arg12[%c0_32, %c0_33] : memref<128x128xf32, #tpu.memory_space<vmem>>, vector<128x128xf32>
      tpu.vector_store %arg12[%c0_32, %c0_33], %48 {strides = array<i32>} : memref<128x128xf32, #tpu.memory_space<vmem>>, vector<128x128xf32>,
      %c0_34 = arith.constant 0 : index
      %c0_35 = arith.constant 0 : index
      %50 = vector.load %arg3[%c0_34, %c0_35] : memref<16x128xbf16, #tpu.memory_space<vmem>>, vector<16x128xbf16>
      %51 = vector.extract_strided_slice %42 {offsets = [0, 0], sizes = [128, 128], strides = [1, 1]} : vector<128x256xbf16> to vector<128x128xbf16>
      %cst_36 = arith.constant dense<0.000000e+00> : vector<16x128xf32>
      %52 = tpu.matmul %50, %51, %cst_36 {dimension_numbers = #tpu.dot_dimension_numbers<[1], [0], [0], [1], [0, 0, 1, 1], [], []>} : vector<16x128xbf16>, vector<128x128xbf16>, vector<16x128xf32> -> vector<16x128xf32>
      %c0_37 = arith.constant 0 : index
      %c0_38 = arith.constant 0 : index
      %53 = vector.load %arg11[%c0_37, %c0_38] : memref<16x128xf32, #tpu.memory_space<vmem>>, vector<16x128xf32>
      tpu.vector_store %arg11[%c0_37, %c0_38], %52 {strides = array<i32>} : memref<16x128xf32, #tpu.memory_space<vmem>>, vector<16x128xf32>,
    } else {
    }
    %c0 = arith.constant 0 : index
    %c0_4 = arith.constant 0 : index
    %8 = vector.load %arg6[%c0, %c0_4] : memref<512x1xi32, #tpu.memory_space<vmem>>, vector<512x1xi32>
    %c0_5 = arith.constant 0 : index
    %c0_6 = arith.constant 0 : index
    %9 = vector.load %arg7[%c0_5, %c0_6] : memref<512x1xi32, #tpu.memory_space<vmem>>, vector<512x1xi32>
    %c0_7 = arith.constant 0 : index
    %c0_8 = arith.constant 0 : index
    %10 = vector.load %arg8[%c0_7, %c0_8] : memref<1x512xi32, #tpu.memory_space<vmem>>, vector<1x512xi32>
    %11 = tpu.iota {dimensions = array<i32: 1>} : vector<512x128xi32>
    %12 = vector.broadcast %8 : vector<512x1xi32> to vector<512x128xi32>
    %13 = arith.cmpi eq, %12, %11 : vector<512x128xi32>
    %14 = arith.extui %13 : vector<512x128xi1> to vector<512x128xi32>
    %15 = arith.sitofp %14 : vector<512x128xi32> to vector<512x128xf32>
    %16 = tpu.iota {dimensions = array<i32: 1>} : vector<512x16xi32>
    %17 = vector.broadcast %9 : vector<512x1xi32> to vector<512x16xi32>
    %18 = arith.cmpi eq, %17, %16 : vector<512x16xi32>
    %19 = arith.extui %18 : vector<512x16xi1> to vector<512x16xi32>
    %20 = arith.sitofp %19 : vector<512x16xi32> to vector<512x16xf32>
    %c0_9 = arith.constant 0 : index
    %c0_10 = arith.constant 0 : index
    %21 = vector.load %arg10[%c0_9, %c0_10] : memref<128x128xf32, #tpu.memory_space<vmem>>, vector<128x128xf32>
    %cst = arith.constant dense<0.000000e+00> : vector<512x128xf32>
    %22 = tpu.matmul %15, %21, %cst {dimension_numbers = #tpu.dot_dimension_numbers<[1], [0], [0], [1], [0, 0, 1, 1], [], []>} : vector<512x128xf32>, vector<128x128xf32>, vector<512x128xf32> -> vector<512x128xf32>
    %c0_11 = arith.constant 0 : index
    %c0_12 = arith.constant 0 : index
    %23 = vector.load %arg11[%c0_11, %c0_12] : memref<16x128xf32, #tpu.memory_space<vmem>>, vector<16x128xf32>
    %cst_13 = arith.constant dense<0.000000e+00> : vector<512x128xf32>
    %24 = tpu.matmul %20, %23, %cst_13 {dimension_numbers = #tpu.dot_dimension_numbers<[1], [0], [0], [1], [0, 0, 1, 1], [], []>} : vector<512x16xf32>, vector<16x128xf32>, vector<512x128xf32> -> vector<512x128xf32>
    %25 = arith.addf %22, %24 : vector<512x128xf32>
    %26 = tpu.iota {dimensions = array<i32: 0>} : vector<128x512xi32>
    %27 = vector.broadcast %10 : vector<1x512xi32> to vector<128x512xi32>
    %28 = arith.cmpi eq, %27, %26 : vector<128x512xi32>
    %c0_14 = arith.constant 0 : index
    %c0_15 = arith.constant 0 : index
    %29 = vector.load %arg5[%c0_14, %c0_15] : memref<128x1xf32, #tpu.memory_space<vmem>>, vector<128x1xf32>
    %cst_16 = arith.constant 0.000000e+00 : f32
    %30 = vector.shape_cast %29 : vector<128x1xf32> to vector<128x1xf32>
    %31 = vector.broadcast %30 : vector<128x1xf32> to vector<128x512xf32>
    %32 = vector.broadcast %cst_16 : f32 to vector<128x512xf32>
    %33 = arith.select %28, %31, %32 : vector<128x512xi1>, vector<128x512xf32>
    %c0_17 = arith.constant 0 : index
    %c0_18 = arith.constant 0 : index
    %34 = vector.load %arg12[%c0_17, %c0_18] : memref<128x128xf32, #tpu.memory_space<vmem>>, vector<128x128xf32>
    %cst_19 = arith.constant dense<0.000000e+00> : vector<128x128xf32>
    %35 = tpu.matmul %33, %25, %cst_19 {dimension_numbers = #tpu.dot_dimension_numbers<[1], [0], [0], [1], [0, 0, 1, 1], [], []>} : vector<128x512xf32>, vector<512x128xf32>, vector<128x128xf32> -> vector<128x128xf32>
    %36 = arith.addf %34, %35 : vector<128x128xf32>
    %c0_20 = arith.constant 0 : index
    %c0_21 = arith.constant 0 : index
    %37 = vector.load %arg12[%c0_20, %c0_21] : memref<128x128xf32, #tpu.memory_space<vmem>>, vector<128x128xf32>
    tpu.vector_store %arg12[%c0_20, %c0_21], %36 {strides = array<i32>} : memref<128x128xf32, #tpu.memory_space<vmem>>, vector<128x128xf32>,
    %c0_i32_22 = arith.constant 0 : i32
    %38 = arith.cmpi eq, %arg1, %c0_i32_22 : i32
    %39 = arith.extui %38 : i1 to i32
    %c0_i32_23 = arith.constant 0 : i32
    %40 = arith.cmpi ne, %39, %c0_i32_23 : i32
    scf.if %40 {
      %c0_24 = arith.constant 0 : index
      %c0_25 = arith.constant 0 : index
      %41 = vector.load %arg12[%c0_24, %c0_25] : memref<128x128xf32, #tpu.memory_space<vmem>>, vector<128x128xf32>
      %cst_26 = arith.constant 0.000000e+00 : f32
      %42 = vector.broadcast %cst_26 : f32 to vector<128x128xf32>
      %43 = arith.cmpf oge, %41, %42 : vector<128x128xf32>
      %cst_27 = arith.constant 0.229166672 : f32
      %44 = vector.broadcast %cst_27 : f32 to vector<128x128xf32>
      %45 = arith.mulf %44, %41 : vector<128x128xf32>
      %46 = arith.select %43, %41, %45 : vector<128x128xi1>, vector<128x128xf32>
      %c0_28 = arith.constant 0 : index
      %c0_29 = arith.constant 0 : index
      %47 = vector.load %arg9[%c0_28, %c0_29] : memref<128x128xf32, #tpu.memory_space<vmem>>, vector<128x128xf32>
      tpu.vector_store %arg9[%c0_28, %c0_29], %46 {strides = array<i32>} : memref<128x128xf32, #tpu.memory_space<vmem>>, vector<128x128xf32>,
    } else {
    }
    return
  }
  func.func @transform_1(%arg0: i32, %arg1: i32) -> (i32, i32) {
    %c0_i32 = arith.constant 0 : i32
    %c0_i32_0 = arith.constant 0 : i32
    %c0_i32_1 = arith.constant 0 : i32
    return %c0_i32, %c0_i32_0 : i32, i32
  }
  func.func @transform_2(%arg0: i32, %arg1: i32) -> (i32, i32, i32) {
    %c0_i32 = arith.constant 0 : i32
    %c0_i32_0 = arith.constant 0 : i32
    %c0_i32_1 = arith.constant 0 : i32
    return %arg0, %c0_i32, %c0_i32_0 : i32, i32, i32
  }
  func.func @transform_3(%arg0: i32, %arg1: i32) -> (i32, i32) {
    %c0_i32 = arith.constant 0 : i32
    %c0_i32_0 = arith.constant 0 : i32
    %c0_i32_1 = arith.constant 0 : i32
    return %c0_i32, %c0_i32_0 : i32, i32
  }
  func.func @transform_4(%arg0: i32, %arg1: i32) -> (i32, i32) {
    %c0_i32 = arith.constant 0 : i32
    %c0_i32_0 = arith.constant 0 : i32
    return %arg1, %c0_i32 : i32, i32
  }
  func.func @transform_5(%arg0: i32, %arg1: i32) -> (i32, i32) {
    %c0_i32 = arith.constant 0 : i32
    %c0_i32_0 = arith.constant 0 : i32
    return %arg1, %c0_i32 : i32, i32
  }
  func.func @transform_6(%arg0: i32, %arg1: i32) -> (i32, i32) {
    %c0_i32 = arith.constant 0 : i32
    %c0_i32_0 = arith.constant 0 : i32
    return %c0_i32, %arg1 : i32, i32
  }
  func.func @transform_7(%arg0: i32, %arg1: i32) -> (i32, i32) {
    %c0_i32 = arith.constant 0 : i32
    %c0_i32_0 = arith.constant 0 : i32
    %c0_i32_1 = arith.constant 0 : i32
    return %c0_i32, %c0_i32_0 : i32, i32
  }
}

</mosaic_0001>

<bundles_post_ra>
// kernel: tpu_custom_call.1
= control target key start
LH: loop header
LB: loop body
LE: loop exit
PB: predicated region body
PF: predicated region fallthrough
CT: control target
= control target key end

     0   :  { %12 = vsyncpa [#allocation7], 0  ;;  %s4634_s24 = smov 0   ;;  %s4636_s25 = smov 0   ;;  %s6367_s0 = inlined_call_operand.vmem [shape: f32[128,128], index: 0, kind: input, shape index: {}]   ;;  %s6368_s1 = inlined_call_operand.vmem [shape: bf16[16,128], index: 1, kind: input, shape index: {}]   ;;  %s6369_s2 = inlined_call_operand.vmem [shape: bf16[2,128,256], index: 2, kind: input, shape index: {}]   ;;  %s6370_s3 = inlined_call_operand.vmem [shape: f32[128,1], index: 3, kind: input, shape index: {}]   ;;  %s6371_s4 = inlined_call_operand.vmem [shape: s32[512,1], index: 4, kind: input, shape index: {}]   ;;  %s6372_s5 = inlined_call_operand.vmem [shape: s32[512,1], index: 5, kind: input, shape index: {}]   ;;  %s6373_s6 = inlined_call_operand.vmem [shape: s32[1,512], index: 6, kind: input, shape index: {}]   ;;  %s6374_s7 = inlined_call_operand.hbm [shape: f32[128,128], index: 7, kind: output, shape index: {}]  }
   0x1   :  { %s4638_s26 = smov 0  }
   0x2 LB: > { %s3386_s27 = sadd.s32 4294967295, %s4585_s26   ;;  %s30_s28 = sadd.s32 1, %s4581_s25  ;;  %s4585_s26 = sphi %s4638_s26, %s18_s26   ;;  %s4581_s25 = sphi %s4636_s25, %s6458_s25   ;;  %s4577_s24 = sphi %s4634_s24, %s6457_s24  }
   0x3   : > { %p32_p0 = scmp.ge.s32.totalorder %s30_s28, 2  ;;  %p3392_p1 = scmp.ge.s32.totalorder %s4585_s26, 1 }
   0x4   : > { %p253_p2 = scmp.lt.s32.totalorder %s4585_s26, 3 }
   0x5   : > { %s6460_s28 = smov (%p32_p0, %s30_s28), 0 }
   0x6   : > { %p254_p3 = pnand %p3392_p1, %p253_p2 }
   0x8   : > { %257 = sbr.rel (%p254_p3) target bundleno = 1117 (0x45d), region = 44 }
   0xf   : > { %p292_p4 = scmp.lt.s32.totalorder %s4577_s24, 1  ;;  %p315_p5 = scmp.eq.s32.totalorder %s4577_s24, 0 }
  0x10   : > { %v353_v0 = vld [vmem:[%s6367_s0] sm:$0xff] (%p315_p5)  ;;  %v355_v1 = vld [vmem:[%s6367_s0 + $0x8] sm:$0xff] (%p315_p5)  ;;  %v357_v2 = vld [vmem:[%s6367_s0 + $0x10] sm:$0xff] (%p315_p5) }
  0x11   : > { %s6462_s24 = smov (!%p292_p4, %s4577_s24), 1  ;;  %320 = sbr.rel (!%p315_p5) target bundleno = 29 (0x1d), region = 48 }
  0x12   : > { %s3738_s29 = sshll.u32 %s6462_s24, 7  ;;  %354 = vst [vmem:[#allocation6] sm:$0xff] (%p315_p5), %v353_v0  ;;  %356 = vst [vmem:[#allocation6 + $0x8] sm:$0xff] (%p315_p5), %v355_v1  ;;  %v359_v3 = vld [vmem:[%s6367_s0 + $0x18] sm:$0xff] (%p315_p5)  ;;  %v361_v4 = vld [vmem:[%s6367_s0 + $0x20] sm:$0xff] (%p315_p5) }
  0x13   : > { %s4656_s9 = scalar_lea.vmem %s6369_s2, %s3738_s29  ;;  %358 = vst [vmem:[#allocation6 + $0x10] sm:$0xff] (%p315_p5), %v357_v2  ;;  %v363_v5 = vld [vmem:[%s6367_s0 + $0x28] sm:$0xff] (%p315_p5)  ;;  %360 = vst [vmem:[#allocation6 + $0x18] sm:$0xff] (%p315_p5), %v359_v3  ;;  %v365_v6 = vld [vmem:[%s6367_s0 + $0x30] sm:$0xff] (%p315_p5) }
  0x14   : > { %362 = vst [vmem:[#allocation6 + $0x20] sm:$0xff] (%p315_p5), %v361_v4  ;;  %364 = vst [vmem:[#allocation6 + $0x28] sm:$0xff] (%p315_p5), %v363_v5  ;;  %v367_v7 = vld [vmem:[%s6367_s0 + $0x38] sm:$0xff] (%p315_p5)  ;;  %v369_v8 = vld [vmem:[%s6367_s0 + $0x40] sm:$0xff] (%p315_p5) }
  0x15   : > { %366 = vst [vmem:[#allocation6 + $0x30] sm:$0xff] (%p315_p5), %v365_v6  ;;  %368 = vst [vmem:[#allocation6 + $0x38] sm:$0xff] (%p315_p5), %v367_v7  ;;  %v371_v9 = vld [vmem:[%s6367_s0 + $0x48] sm:$0xff] (%p315_p5)  ;;  %v373_v10 = vld [vmem:[%s6367_s0 + $0x50] sm:$0xff] (%p315_p5) }
  0x16   : > { %370 = vst [vmem:[#allocation6 + $0x40] sm:$0xff] (%p315_p5), %v369_v8  ;;  %v375_v11 = vld [vmem:[%s6367_s0 + $0x58] sm:$0xff] (%p315_p5)  ;;  %372 = vst [vmem:[#allocation6 + $0x48] sm:$0xff] (%p315_p5), %v371_v9  ;;  %v377_v12 = vld [vmem:[%s6367_s0 + $0x60] sm:$0xff] (%p315_p5) }
  0x17   : > { %374 = vst [vmem:[#allocation6 + $0x50] sm:$0xff] (%p315_p5), %v373_v10  ;;  %376 = vst [vmem:[#allocation6 + $0x58] sm:$0xff] (%p315_p5), %v375_v11  ;;  %v379_v13 = vld [vmem:[%s6367_s0 + $0x68] sm:$0xff] (%p315_p5)  ;;  %v381_v14 = vld [vmem:[%s6367_s0 + $0x70] sm:$0xff] (%p315_p5) }
  0x18   : > { %378 = vst [vmem:[#allocation6 + $0x60] sm:$0xff] %v377_v12  ;;  %380 = vst [vmem:[#allocation6 + $0x68] sm:$0xff] %v379_v13  ;;  %v383_v15 = vld [vmem:[%s6367_s0 + $0x78] sm:$0xff] }
  0x19   : > { %382 = vst [vmem:[#allocation6 + $0x70] sm:$0xff] %v381_v14  ;;  %384 = vst [vmem:[#allocation6 + $0x78] sm:$0xff] %v383_v15 }
  0x1a   : > { %392 = vsyncadd [#allocation5], 2048 }
  0x1b   : > { %4569 = dma.done.wait [#allocation5], 2048 }
  0x1c   : > { %4570 = vsyncadd [#allocation5], 4294965248 }
  0x1d PF: > { %v781_v16 = vld [vmem:[%s6372_s5 + $0x10] sm:$0xff]  ;;  %v779_v17 = vld [vmem:[%s6372_s5] sm:$0xff]  ;;  %v4587_v18 = vmov 0   ;;  %v782_v21 = vld [vmem:[%s6372_s5 + $0x18] sm:$0xff]  ;;  %v6376_v54 = vmov 0.0   ;;  %vm4589_vm0 = vmmov 0  }
  0x1e   : > { %4505 = vset.pattern.permute.xlu1 %v4587_v18  ;;  %4504 = vset.pattern.permute.xlu0 %v4587_v18  ;;  %v4506_v19 = vld [vmem:[%s4656_s9 + $0x4] ss:$8 sps:$4 sm:$0xff]   ;;  %v4716_v20 = vld [vmem:[%s4656_s9] ss:$8 sps:$4 sm:$0xff]   ;;  %v4509_v23 = vld [vmem:[%s4656_s9 + $0x14] ss:$8 sps:$4 sm:$0xff]  }
  0x1f   : > { %1237 = vperm.xlu1 %4505, %v781_v16   ;;  %1231 = vperm.xlu0 %4504, %v779_v17   ;;  %v780_v22 = vld [vmem:[%s6372_s5 + $0x8] sm:$0xff]  ;;  %v4728_v24 = vld [vmem:[%s4656_s9 + $0x10] ss:$8 sps:$4 sm:$0xff]   ;;  %v783_v27 = vld [vmem:[%s6372_s5 + $0x20] sm:$0xff]  ;;  %vm1632_vm2 = vcmask 130048   ;;  %s4591_s14 = smov [#allocation6]  }
  0x20   : > { %519 = vmatprep.subr.bf16.mxu0 %v4506_v19  ;;  %551 = vmatprep.mubr.bf16.mxu0 %v4587_v18  ;;  %v4512_v25 = vld [vmem:[%s4656_s9 + $0x24] ss:$8 sps:$4 sm:$0xff]   ;;  %v4739_v28 = vld [vmem:[%s4656_s9 + $0x20] ss:$8 sps:$4 sm:$0xff]   ;;  %v4515_v29 = vld [vmem:[%s4656_s9 + $0x34] ss:$8 sps:$4 sm:$0xff]  }
  0x21   : > { %520 = vmatpush1.bf16.msra.mxu0 %v4716_v20  ;;  %v784_v26 = vld [vmem:[%s6372_s5 + $0x28] sm:$0xff]  ;;  %v786_v30 = vld [vmem:[%s6372_s5 + $0x38] sm:$0xff]  ;;  %v785_v31 = vld [vmem:[%s6372_s5 + $0x30] sm:$0xff]  ;;  %s3279_s15 = sshll.u32 %s4591_s14, 4  ;;  %p6332_p6 = scmp.eq.s32.totalorder %s3386_s27, 1  ;;  %s3280_s15 = int_to_ptr.vmem [resolvable:$true] %s3279_s15 }
  0x22   : > { %521 = vmatprep.subr.bf16.mxu0 %v4509_v23  ;;  %v4750_v32 = vld [vmem:[%s4656_s9 + $0x30] ss:$8 sps:$4 sm:$0xff]   ;;  %v4518_v33 = vld [vmem:[%s4656_s9 + $0x44] ss:$8 sps:$4 sm:$0xff]   ;;  %v4761_v36 = vld [vmem:[%s4656_s9 + $0x40] ss:$8 sps:$4 sm:$0xff]   ;;  %p4538_p10 = scmp.lt.s32.totalorder %s3280_s15, %s3280_s15 }
  0x23   : > { %1240 = vperm.xlu1 %4505, %v782_v21   ;;  %1234 = vperm.xlu0 %4504, %v780_v22   ;;  %v788_v34 = vld [vmem:[%s6372_s5 + $0x48] sm:$0xff]  ;;  %v787_v35 = vld [vmem:[%s6372_s5 + $0x40] sm:$0xff]  ;;  %v4521_v37 = vld [vmem:[%s4656_s9 + $0x54] ss:$8 sps:$4 sm:$0xff]   ;;  %s4531_s17 = scalar_lea.vmem %s3280_s15, 2048 }
  0x24   : > { %v790_v38 = vld [vmem:[%s6372_s5 + $0x58] sm:$0xff]  ;;  %v789_v39 = vld [vmem:[%s6372_s5 + $0x50] sm:$0xff]  ;;  %v4524_v41 = vld [vmem:[%s4656_s9 + $0x64] ss:$8 sps:$4 sm:$0xff]   ;;  %p4532_p7 = scmp.ne.s32.totalorder %s3280_s15, %s4531_s17  ;;  %p4539_p11 = scmp.lt.s32.totalorder %s4531_s17, %s4531_s17 }
  0x25   : > { %522 = vmatpush1.bf16.msra.mxu0 %v4728_v24  ;;  %v4772_v40 = vld [vmem:[%s4656_s9 + $0x50] ss:$8 sps:$4 sm:$0xff]   ;;  %v792_v42 = vld [vmem:[%s6372_s5 + $0x68] sm:$0xff]  ;;  %v791_v43 = vld [vmem:[%s6372_s5 + $0x60] sm:$0xff] }
  0x26   : > { %523 = vmatprep.subr.bf16.mxu0 %v4512_v25  ;;  %v4783_v44 = vld [vmem:[%s4656_s9 + $0x60] ss:$8 sps:$4 sm:$0xff]   ;;  %v4527_v45 = vld [vmem:[%s4656_s9 + $0x74] ss:$8 sps:$4 sm:$0xff]   ;;  %v4794_v48 = vld [vmem:[%s4656_s9 + $0x70] ss:$8 sps:$4 sm:$0xff]   ;;  %p4533_p8 = pnand %p4532_p7, %p6332_p6  ;;  %p4540_p12 = por %p4539_p11, %p4538_p10 }
  0x27   : > { %1246 = vperm.xlu1 %4505, %v784_v26   ;;  %1243 = vperm.xlu0 %4504, %v783_v27   ;;  %v794_v46 = vld [vmem:[%s6372_s5 + $0x78] sm:$0xff]  ;;  %v793_v47 = vld [vmem:[%s6372_s5 + $0x70] sm:$0xff]  ;;  %v415_v49 = vld [vmem:[#allocation6] sm:$0xff] }
  0x28   : > { %v416_v50 = vld [vmem:[#allocation6 + $0x8] sm:$0xff]  ;;  %v795_v52 = vld [vmem:[%s6372_s5 + $0x80] sm:$0xff]  ;;  %v798_v55 = vld [vmem:[%s6372_s5 + $0x98] sm:$0xff]  ;;  %p4534_p9 = pneg %p4533_p8 }
  0x29   : > { %524 = vmatpush1.bf16.msra.mxu0 %v4739_v28  ;;  %v796_v51 = vld [vmem:[%s6372_s5 + $0x88] sm:$0xff]  ;;  %v431_v53 = vpack.c.bf16 %v416_v50, %v415_v49  ;;  %v797_v56 = vld [vmem:[%s6372_s5 + $0x90] sm:$0xff]  ;;  %v418_v58 = vld [vmem:[#allocation6 + $0x18] sm:$0xff] }
  0x2a   : > { %525 = vmatprep.subr.bf16.mxu0 %v4515_v29  ;;  %v417_v57 = vld [vmem:[#allocation6 + $0x10] sm:$0xff]  ;;  %v800_v59 = vld [vmem:[%s6372_s5 + $0xa8] sm:$0xff]  ;;  %v799_v60 = vld [vmem:[%s6372_s5 + $0xa0] sm:$0xff]  ;;  %p4541_p13 = pnand %p4540_p12, %p4534_p9 }
  0x2b   : > { %1252 = vperm.xlu1 %4505, %v786_v30   ;;  %1249 = vperm.xlu0 %4504, %v785_v31   ;;  %v432_v61 = vpack.c.bf16 %v418_v58, %v417_v57  ;;  %v802_v62 = vld [vmem:[%s6372_s5 + $0xb8] sm:$0xff]  ;;  %v801_v63 = vld [vmem:[%s6372_s5 + $0xb0] sm:$0xff]  ;;  %v419_v0 = vld [vmem:[#allocation6 + $0x20] sm:$0xff] }
  0x2c   : > { %v420_v1 = vld [vmem:[#allocation6 + $0x28] sm:$0xff]  ;;  %v803_v3 = vld [vmem:[%s6372_s5 + $0xc0] sm:$0xff]  ;;  %v806_v5 = vld [vmem:[%s6372_s5 + $0xd8] sm:$0xff] }
  0x2d   : > { %526 = vmatpush1.bf16.msra.mxu0 %v4750_v32  ;;  %v804_v2 = vld [vmem:[%s6372_s5 + $0xc8] sm:$0xff]  ;;  %v433_v4 = vpack.c.bf16 %v420_v1, %v419_v0  ;;  %v805_v6 = vld [vmem:[%s6372_s5 + $0xd0] sm:$0xff]  ;;  %v422_v8 = vld [vmem:[#allocation6 + $0x38] sm:$0xff] }
  0x2e   : > { %527 = vmatprep.subr.bf16.mxu0 %v4518_v33  ;;  %v421_v7 = vld [vmem:[#allocation6 + $0x30] sm:$0xff]  ;;  %v808_v9 = vld [vmem:[%s6372_s5 + $0xe8] sm:$0xff]  ;;  %v807_v10 = vld [vmem:[%s6372_s5 + $0xe0] sm:$0xff] }
  0x2f   : > { %1258 = vperm.xlu1 %4505, %v788_v34   ;;  %1255 = vperm.xlu0 %4504, %v787_v35   ;;  %v434_v11 = vpack.c.bf16 %v422_v8, %v421_v7  ;;  %v810_v12 = vld [vmem:[%s6372_s5 + $0xf8] sm:$0xff]  ;;  %v809_v13 = vld [vmem:[%s6372_s5 + $0xf0] sm:$0xff]  ;;  %v423_v14 = vld [vmem:[#allocation6 + $0x40] sm:$0xff] }
  0x30   : > { %v424_v15 = vld [vmem:[#allocation6 + $0x48] sm:$0xff]  ;;  %v811_v17 = vld [vmem:[%s6372_s5 + $0x100] sm:$0xff]  ;;  %v813_v21 = vld [vmem:[%s6372_s5 + $0x110] sm:$0xff] }
  0x31   : > { %528 = vmatpush1.bf16.msra.mxu0 %v4761_v36  ;;  %v812_v16 = vld [vmem:[%s6372_s5 + $0x108] sm:$0xff]  ;;  %v435_v19 = vpack.c.bf16 %v424_v15, %v423_v14  ;;  %v425_v22 = vld [vmem:[#allocation6 + $0x50] sm:$0xff]  ;;  %v426_v23 = vld [vmem:[#allocation6 + $0x58] sm:$0xff] }
  0x32   : > { %529 = vmatprep.subr.bf16.mxu0 %v4521_v37  ;;  %v815_v25 = vld [vmem:[%s6372_s5 + $0x120] sm:$0xff]  ;;  %v436_v26 = vpack.c.bf16 %v426_v23, %v425_v22  ;;  %v818_v27 = vld [vmem:[%s6372_s5 + $0x138] sm:$0xff]  ;;  %v428_v30 = vld [vmem:[#allocation6 + $0x68] sm:$0xff] }
  0x33   : > { %1264 = vperm.xlu1 %4505, %v790_v38   ;;  %1261 = vperm.xlu0 %4504, %v789_v39   ;;  %v427_v29 = vld [vmem:[#allocation6 + $0x60] sm:$0xff]  ;;  %v820_v31 = vld [vmem:[%s6372_s5 + $0x148] sm:$0xff]  ;;  %v822_v34 = vld [vmem:[%s6372_s5 + $0x158] sm:$0xff] }
  0x34   : > { %v437_v33 = vpack.c.bf16 %v428_v30, %v427_v29  ;;  %v821_v35 = vld [vmem:[%s6372_s5 + $0x150] sm:$0xff]  ;;  %v430_v37 = vld [vmem:[#allocation6 + $0x78] sm:$0xff]  ;;  %v824_v38 = vld [vmem:[%s6372_s5 + $0x168] sm:$0xff] }
  0x35   : > { %530 = vmatpush1.bf16.msra.mxu0 %v4772_v40  ;;  %v823_v39 = vld [vmem:[%s6372_s5 + $0x160] sm:$0xff]  ;;  %v834_v49 = vld [vmem:[%s6372_s5 + $0x1b8] sm:$0xff]  ;;  %v833_v50 = vld [vmem:[%s6372_s5 + $0x1b0] sm:$0xff] }
  0x36   : > { %531 = vmatprep.subr.bf16.mxu0 %v4524_v41  ;;  %v825_v41 = vld [vmem:[%s6372_s5 + $0x170] sm:$0xff]  ;;  %v839_v57 = vld [vmem:[%s6372_s5 + $0x1e0] sm:$0xff]  ;;  %v842_v58 = vld [vmem:[%s6372_s5 + $0x1f8] sm:$0xff] }
  0x37   : > { %1270 = vperm.xlu1 %4505, %v792_v42   ;;  %1267 = vperm.xlu0 %4504, %v791_v43   ;;  %v828_v42 = vld [vmem:[%s6372_s5 + $0x188] sm:$0xff]  ;;  %v827_v43 = vld [vmem:[%s6372_s5 + $0x180] sm:$0xff]  ;;  %v717_v0 = vld [vmem:[%s6371_s4 + $0x10] sm:$0xff] }
  0x38   : > { %v724_v8 = vld [vmem:[%s6371_s4 + $0x48] sm:$0xff]  ;;  %v727_v15 = vld [vmem:[%s6371_s4 + $0x60] sm:$0xff] }
  0x39   : > { %532 = vmatpush1.bf16.msra.mxu0 %v4783_v44  ;;  %v728_v14 = vld [vmem:[%s6371_s4 + $0x68] sm:$0xff]  ;;  %v731_v23 = vld [vmem:[%s6371_s4 + $0x80] sm:$0xff] }
  0x3a   : > { %533 = vmatprep.subr.bf16.mxu0 %v4527_v45  ;;  %v830_v45 = vld [vmem:[%s6372_s5 + $0x198] sm:$0xff]  ;;  %v732_v22 = vld [vmem:[%s6371_s4 + $0x88] sm:$0xff] }
  0x3b   : > { %1276 = vperm.xlu1 %4505, %v794_v46   ;;  %1273 = vperm.xlu0 %4504, %v793_v47   ;;  %v829_v46 = vld [vmem:[%s6372_s5 + $0x190] sm:$0xff]  ;;  %v832_v47 = vld [vmem:[%s6372_s5 + $0x1a8] sm:$0xff] }
  0x3c   : > { %v736_v30 = vld [vmem:[%s6371_s4 + $0xa8] sm:$0xff] }
  0x3d   : > { %534 = vmatpush1.bf16.msra.mxu0 %v4794_v48 }
  0x3e   : > { %4055 = vmatprep.subr.bf16.mxu0 %v6376_v54 }
  0x3f   : > { %1282 = vperm.xlu1 %4505, %v796_v51   ;;  %1279 = vperm.xlu0 %4504, %v795_v52   ;;  %v836_v51 = vld [vmem:[%s6372_s5 + $0x1c8] sm:$0xff]  ;;  %v835_v52 = vld [vmem:[%s6372_s5 + $0x1c0] sm:$0xff] }
  0x40   : > { %552 = vmatmul.mubr.bf16.vlgmr.msra.gmra.mrb[0].mxu0 %v431_v53  ;;  %v838_v53 = vld [vmem:[%s6372_s5 + $0x1d8] sm:$0xff] }
  0x41   : > { %561 = vmatprep.mubr.bf16.mxu0 %v4587_v18  ;;  %4056 = vmatpush3.bf16.msra.mxu0 %v4716_v20  ;;  %v814_v20 = vld [vmem:[%s6372_s5 + $0x118] sm:$0xff] }
  0x42   : > { %4057 = vmatprep.subr.bf16.mxu0 %v6376_v54 }
  0x43   : > { %1288 = vperm.xlu1 %4505, %v798_v55   ;;  %1285 = vperm.xlu0 %4504, %v797_v56   ;;  %v837_v55 = vld [vmem:[%s6372_s5 + $0x1d0] sm:$0xff]  ;;  %v840_v56 = vld [vmem:[%s6372_s5 + $0x1e8] sm:$0xff] }
  0x45   : > { %4058 = vmatpush3.bf16.msra.mxu0 %v4728_v24  ;;  %v816_v24 = vld [vmem:[%s6372_s5 + $0x128] sm:$0xff] }
  0x46   : > { %4059 = vmatprep.subr.bf16.mxu0 %v6376_v54 }
  0x47   : > { %1294 = vperm.xlu1 %4505, %v800_v59   ;;  %1291 = vperm.xlu0 %4504, %v799_v60   ;;  %v841_v59 = vld [vmem:[%s6372_s5 + $0x1f0] sm:$0xff]  ;;  %v716_v60 = vld [vmem:[%s6371_s4 + $0x8] sm:$0xff] }
  0x48   : > { %562 = vmatmul.mubr.bf16.gmra.mrb[4].mxu0 %v432_v61  ;;  %v715_v61 = vld [vmem:[%s6371_s4] sm:$0xff] }
  0x49   : > { %571 = vmatprep.mubr.bf16.mxu0 %v4587_v18  ;;  %4060 = vmatpush3.bf16.msra.mxu0 %v4739_v28  ;;  %v817_v28 = vld [vmem:[%s6372_s5 + $0x130] sm:$0xff] }
  0x4a   : > { %4061 = vmatprep.subr.bf16.mxu0 %v6376_v54 }
  0x4b   : > { %1300 = vperm.xlu1 %4505, %v802_v62   ;;  %1297 = vperm.xlu0 %4504, %v801_v63   ;;  %v718_v63 = vld [vmem:[%s6371_s4 + $0x18] sm:$0xff] }
  0x4d   : > { %4062 = vmatpush3.bf16.msra.mxu0 %v4750_v32  ;;  %v819_v32 = vld [vmem:[%s6372_s5 + $0x140] sm:$0xff] }
  0x4e   : > { %4063 = vmatprep.subr.bf16.mxu0 %v6376_v54 }
  0x4f   : > { %1306 = vperm.xlu1 %4505, %v804_v2   ;;  %1303 = vperm.xlu0 %4504, %v803_v3   ;;  %v720_v2 = vld [vmem:[%s6371_s4 + $0x28] sm:$0xff]  ;;  %v719_v3 = vld [vmem:[%s6371_s4 + $0x20] sm:$0xff] }
  0x50   : > { %572 = vmatmul.mubr.bf16.gmra.mrb[8].mxu0 %v433_v4 }
  0x51   : > { %581 = vmatprep.mubr.bf16.mxu0 %v4587_v18  ;;  %4064 = vmatpush3.bf16.msra.mxu0 %v4761_v36  ;;  %v429_v36 = vld [vmem:[#allocation6 + $0x70] sm:$0xff] }
  0x52   : > { %4065 = vmatprep.subr.bf16.mxu0 %v6376_v54 }
  0x53   : > { %1312 = vperm.xlu1 %4505, %v806_v5   ;;  %1309 = vperm.xlu0 %4504, %v805_v6   ;;  %v722_v5 = vld [vmem:[%s6371_s4 + $0x38] sm:$0xff]  ;;  %v721_v6 = vld [vmem:[%s6371_s4 + $0x30] sm:$0xff] }
  0x55   : > { %4066 = vmatpush3.bf16.msra.mxu0 %v4772_v40  ;;  %v438_v40 = vpack.c.bf16 %v430_v37, %v429_v36  ;;  %v740_v37 = vld [vmem:[%s6371_s4 + $0xc8] sm:$0xff] }
  0x56   : > { %4067 = vmatprep.subr.bf16.mxu0 %v6376_v54 }
  0x57   : > { %1318 = vperm.xlu1 %4505, %v808_v9   ;;  %1315 = vperm.xlu0 %4504, %v807_v10   ;;  %v723_v9 = vld [vmem:[%s6371_s4 + $0x40] sm:$0xff] }
  0x58   : > { %582 = vmatmul.mubr.bf16.gmra.mrb[12].mxu0 %v434_v11  ;;  %v726_v11 = vld [vmem:[%s6371_s4 + $0x58] sm:$0xff] }
  0x59   : > { %591 = vmatprep.mubr.bf16.mxu0 %v4587_v18  ;;  %4068 = vmatpush3.bf16.msra.mxu0 %v4783_v44  ;;  %v4530_v44 = vld [vmem:[%s6368_s1] sm:$0xff]  }
  0x5a   : > { %4069 = vmatprep.subr.bf16.mxu0 %v6376_v54 }
  0x5b   : > { %1324 = vperm.xlu1 %4505, %v810_v12   ;;  %1321 = vperm.xlu0 %4504, %v809_v13   ;;  %v725_v12 = vld [vmem:[%s6371_s4 + $0x50] sm:$0xff] }
  0x5d   : > { %4070 = vmatpush3.bf16.msra.mxu0 %v4794_v48  ;;  %v831_v48 = vld [vmem:[%s6372_s5 + $0x1a0] sm:$0xff] }
  0x5f   : > { %1330 = vperm.xlu1 %4505, %v812_v16   ;;  %1327 = vperm.xlu0 %4504, %v811_v17  }
  0x60   : > { %592 = vmatmul.mubr.bf16.gmra.mrb[16].mxu0 %v435_v19  ;;  %v730_v19 = vld [vmem:[%s6371_s4 + $0x78] sm:$0xff] }
  0x61   : > { %601 = vmatprep.mubr.bf16.mxu0 %v4587_v18 }
  0x63   : > { %1336 = vperm.xlu1 %4505, %v814_v20   ;;  %1333 = vperm.xlu0 %4504, %v813_v21   ;;  %v729_v20 = vld [vmem:[%s6371_s4 + $0x70] sm:$0xff] }
  0x67   : > { %1342 = vperm.xlu1 %4505, %v816_v24   ;;  %1339 = vperm.xlu0 %4504, %v815_v25  }
  0x68   : > { %602 = vmatmul.mubr.bf16.gmra.mrb[20].mxu0 %v436_v26  ;;  %v734_v26 = vld [vmem:[%s6371_s4 + $0x98] sm:$0xff] }
  0x69   : > { %611 = vmatprep.mubr.bf16.mxu0 %v4587_v18 }
  0x6b   : > { %1348 = vperm.xlu1 %4505, %v818_v27   ;;  %1345 = vperm.xlu0 %4504, %v817_v28   ;;  %v733_v27 = vld [vmem:[%s6371_s4 + $0x90] sm:$0xff] }
  0x6f   : > { %1354 = vperm.xlu1 %4505, %v820_v31   ;;  %1351 = vperm.xlu0 %4504, %v819_v32   ;;  %v735_v31 = vld [vmem:[%s6371_s4 + $0xa0] sm:$0xff] }
  0x70   : > { %612 = vmatmul.mubr.bf16.gmra.mrb[24].mxu0 %v437_v33  ;;  %v738_v33 = vld [vmem:[%s6371_s4 + $0xb8] sm:$0xff] }
  0x71   : > { %621 = vmatprep.mubr.bf16.mxu0 %v4587_v18  ;;  %v826_v18 = vld [vmem:[%s6372_s5 + $0x178] sm:$0xff] }
  0x73   : > { %1360 = vperm.xlu1 %4505, %v822_v34   ;;  %1357 = vperm.xlu0 %4504, %v821_v35   ;;  %v737_v34 = vld [vmem:[%s6371_s4 + $0xb0] sm:$0xff] }
  0x77   : > { %1366 = vperm.xlu1 %4505, %v824_v38   ;;  %1363 = vperm.xlu0 %4504, %v823_v39   ;;  %v739_v38 = vld [vmem:[%s6371_s4 + $0xc0] sm:$0xff] }
  0x78   : > { %622 = vmatmul.mubr.bf16.gmra.mrb[28].mxu0 %v438_v40  ;;  %v6375_v40 = vlaneseq }
  0x79   : > { %4071 = vmatprep.mubr.msk.bf16.mxu0 %vm4589_vm0, %v6376_v54 }
  0x7b   : > { %1372 = vperm.xlu1 %4505, %v826_v18   ;;  %1369 = vperm.xlu0 %4504, %v825_v41   ;;  %v742_v41 = vld [vmem:[%s6371_s4 + $0xd8] sm:$0xff] }
  0x7f   : > { %1378 = vperm.xlu1 %4505, %v828_v42   ;;  %1375 = vperm.xlu0 %4504, %v827_v43   ;;  %v741_v42 = vld [vmem:[%s6371_s4 + $0xd0] sm:$0xff] }
  0x80   : > { %4072 = vmatmul.mubr.bf16.vlgmr.msra.gmra.mrb[32].mxu0 %v4530_v44  ;;  %v5091_v44 = vand.u32 127, %v6375_v40  ;;  %v2694_v40 = vld [vmem:[%s6370_s3 + $0x10] sm:$0xff] }
  0x83   : > { %1384 = vperm.xlu1 %4505, %v830_v45   ;;  %1381 = vperm.xlu0 %4504, %v829_v46   ;;  %v744_v45 = vld [vmem:[%s6371_s4 + $0xe8] sm:$0xff]  ;;  %v743_v46 = vld [vmem:[%s6371_s4 + $0xe0] sm:$0xff] }
  0x87   : > { %1390 = vperm.xlu1 %4505, %v832_v47   ;;  %1387 = vperm.xlu0 %4504, %v831_v48  }
  0x8b   : > { %1396 = vperm.xlu1 %4505, %v834_v49   ;;  %1393 = vperm.xlu0 %4504, %v833_v50   ;;  %v746_v49 = vld [vmem:[%s6371_s4 + $0xf8] sm:$0xff]  ;;  %v745_v50 = vld [vmem:[%s6371_s4 + $0xf0] sm:$0xff] }
  0x8f   : > { %1402 = vperm.xlu1 %4505, %v836_v51   ;;  %1399 = vperm.xlu0 %4504, %v835_v52  }
  0x93   : > { %1408 = vperm.xlu1 %4505, %v838_v53   ;;  %1405 = vperm.xlu0 %4504, %v837_v55   ;;  %v748_v55 = vld [vmem:[%s6371_s4 + $0x108] sm:$0xff] }
  0x97   : > { %1414 = vperm.xlu1 %4505, %v840_v56   ;;  %1411 = vperm.xlu0 %4504, %v839_v57   ;;  %v747_v56 = vld [vmem:[%s6371_s4 + $0x100] sm:$0xff] }
  0x9b   : > { %1420 = vperm.xlu1 %4505, %v842_v58   ;;  %1417 = vperm.xlu0 %4504, %v841_v59   ;;  %v750_v58 = vld [vmem:[%s6371_s4 + $0x118] sm:$0xff]  ;;  %v749_v59 = vld [vmem:[%s6371_s4 + $0x110] sm:$0xff] }
  0x9e   : > { %v4974_v62 = vpop.permute.xlu0 %1231  ;;  %v5024_v17 = vpop.permute.xlu1 %1237 }
  0x9f   : > { %850 = vperm.xlu1 %4505, %v716_v60   ;;  %847 = vperm.xlu0 %4504, %v715_v61   ;;  %vm1422_vm1 = vcmp.eq.s32.totalorder %v4974_v62, %v5091_v44  ;;  %v752_v62 = vld [vmem:[%s6371_s4 + $0x128] sm:$0xff]  ;;  %vm1424_vm3 = vcmp.eq.s32.totalorder %v5024_v17, %v5091_v44 }
  0xa0   : > { %v3477_v51 = vsel %vm1422_vm1, 1.0, %v6376_v54 }
  0xa1   : > { %4079 = vmatprep.mubr.msk.f32.mxu1 %vm1632_vm2, %v3477_v51 }
  0xa2   : > { %v4982_v1 = vpop.permute.xlu0 %1234  ;;  %v5040_v24 = vpop.permute.xlu1 %1240 }
  0xa3   : > { %856 = vperm.xlu1 %4505, %v718_v63   ;;  %853 = vperm.xlu0 %4504, %v717_v0   ;;  %v751_v63 = vld [vmem:[%s6371_s4 + $0x120] sm:$0xff]  ;;  %vm1423_vm4 = vcmp.eq.s32.totalorder %v4982_v1, %v5091_v44  ;;  %vm1425_vm5 = vcmp.eq.s32.totalorder %v5040_v24, %v5091_v44 }
  0xa6   : > { %v4990_v4 = vpop.permute.xlu0 %1243  ;;  %v5052_v29 = vpop.permute.xlu1 %1246 }
  0xa7   : > { %862 = vperm.xlu1 %4505, %v720_v2   ;;  %859 = vperm.xlu0 %4504, %v719_v3   ;;  %v754_v3 = vld [vmem:[%s6371_s4 + $0x138] sm:$0xff]  ;;  %vm1426_vm6 = vcmp.eq.s32.totalorder %v4990_v4, %v5091_v44  ;;  %vm1427_vm7 = vcmp.eq.s32.totalorder %v5052_v29, %v5091_v44 }
  0xaa   : > { %v4998_v7 = vpop.permute.xlu0 %1249  ;;  %v5068_v35 = vpop.permute.xlu1 %1252 }
  0xab   : > { %868 = vperm.xlu1 %4505, %v722_v5   ;;  %865 = vperm.xlu0 %4504, %v721_v6   ;;  %v753_v5 = vld [vmem:[%s6371_s4 + $0x130] sm:$0xff]  ;;  %vm1428_vm8 = vcmp.eq.s32.totalorder %v4998_v7, %v5091_v44  ;;  %vm1429_vm9 = vcmp.eq.s32.totalorder %v5068_v35, %v5091_v44 }
  0xae   : > { %v5006_v10 = vpop.permute.xlu0 %1255  ;;  %v5080_v18 = vpop.permute.xlu1 %1258 }
  0xaf   : > { %874 = vperm.xlu1 %4505, %v724_v8   ;;  %871 = vperm.xlu0 %4504, %v723_v9   ;;  %v756_v8 = vld [vmem:[%s6371_s4 + $0x148] sm:$0xff]  ;;  %v755_v9 = vld [vmem:[%s6371_s4 + $0x140] sm:$0xff]  ;;  %vm1430_vm10 = vcmp.eq.s32.totalorder %v5006_v10, %v5091_v44  ;;  %vm1431_vm11 = vcmp.eq.s32.totalorder %v5080_v18, %v5091_v44 }
  0xb2   : > { %v5014_v13 = vpop.permute.xlu0 %1261  ;;  %v5099_v47 = vpop.permute.xlu1 %1264 }
  0xb3   : > { %880 = vperm.xlu1 %4505, %v726_v11   ;;  %877 = vperm.xlu0 %4504, %v725_v12   ;;  %vm1432_vm12 = vcmp.eq.s32.totalorder %v5014_v13, %v5091_v44  ;;  %vm1433_vm13 = vcmp.eq.s32.totalorder %v5099_v47, %v5091_v44 }
  0xb6   : > { %v5022_v16 = vpop.permute.xlu0 %1267  ;;  %v5115_v53 = vpop.permute.xlu1 %1270 }
  0xb7   : > { %886 = vperm.xlu1 %4505, %v728_v14   ;;  %883 = vperm.xlu0 %4504, %v727_v15   ;;  %v758_v14 = vld [vmem:[%s6371_s4 + $0x158] sm:$0xff]  ;;  %v757_v15 = vld [vmem:[%s6371_s4 + $0x150] sm:$0xff]  ;;  %vm1434_vm14 = vcmp.eq.s32.totalorder %v5022_v16, %v5091_v44  ;;  %vm1435_vm15 = vcmp.eq.s32.totalorder %v5115_v53, %v5091_v44 }
  0xba   : > { %v5032_v21 = vpop.permute.xlu0 %1273  ;;  %v5131_v60 = vpop.permute.xlu1 %1276 }
  0xbb   : > { %892 = vperm.xlu1 %4505, %v730_v19   ;;  %889 = vperm.xlu0 %4504, %v729_v20   ;;  %vm1436_vm0 = vcmp.eq.s32.totalorder %v5032_v21, %v5091_v44  ;;  %vm1437_vm1 = vcmp.eq.s32.totalorder %v5131_v60, %v5091_v44 }
  0xbe   : > { %v5042_v25 = vpop.permute.xlu0 %1279  ;;  %v5143_v2 = vpop.permute.xlu1 %1282 }
  0xbf   : > { %898 = vperm.xlu1 %4505, %v732_v22   ;;  %895 = vperm.xlu0 %4504, %v731_v23   ;;  %v760_v22 = vld [vmem:[%s6371_s4 + $0x168] sm:$0xff]  ;;  %v759_v23 = vld [vmem:[%s6371_s4 + $0x160] sm:$0xff] }
  0xc2   : > { %v5050_v28 = vpop.permute.xlu0 %1285  ;;  %v5159_v11 = vpop.permute.xlu1 %1288 }
  0xc3   : > { %904 = vperm.xlu1 %4505, %v734_v26   ;;  %901 = vperm.xlu0 %4504, %v733_v27   ;;  %v762_v27 = vld [vmem:[%s6371_s4 + $0x178] sm:$0xff] }
  0xc6   : > { %v5060_v32 = vpop.permute.xlu0 %1291  ;;  %v5171_v20 = vpop.permute.xlu1 %1294 }
  0xc7   : > { %910 = vperm.xlu1 %4505, %v736_v30   ;;  %907 = vperm.xlu0 %4504, %v735_v31   ;;  %v761_v30 = vld [vmem:[%s6371_s4 + $0x170] sm:$0xff] }
  0xca   : > { %v5070_v36 = vpop.permute.xlu0 %1297  ;;  %v5187_v31 = vpop.permute.xlu1 %1300 }
  0xcb   : > { %916 = vperm.xlu1 %4505, %v738_v33   ;;  %913 = vperm.xlu0 %4504, %v737_v34   ;;  %v764_v34 = vld [vmem:[%s6371_s4 + $0x188] sm:$0xff] }
  0xce   : > { %v5078_v39 = vpop.permute.xlu0 %1303 }
  0xcf   : > { %922 = vperm.xlu1 %4505, %v740_v37   ;;  %919 = vperm.xlu0 %4504, %v739_v38   ;;  %v763_v37 = vld [vmem:[%s6371_s4 + $0x180] sm:$0xff] }
  0xd2   : > { %v5088_v43 = vpop.permute.xlu0 %1309 }
  0xd3   : > { %928 = vperm.xlu1 %4505, %v742_v41   ;;  %925 = vperm.xlu0 %4504, %v741_v42   ;;  %v5199_v41 = vpop.permute.xlu1 %1306  ;;  %v766_v42 = vld [vmem:[%s6371_s4 + $0x198] sm:$0xff] }
  0xd6   : > { %v5101_v48 = vpop.permute.xlu0 %1315 }
  0xd7   : > { %934 = vperm.xlu1 %4505, %v744_v45   ;;  %931 = vperm.xlu0 %4504, %v743_v46   ;;  %v765_v45 = vld [vmem:[%s6371_s4 + $0x190] sm:$0xff]  ;;  %v5215_v51 = vpop.permute.xlu1 %1312 }
  0xda   : > { %v5113_v52 = vpop.permute.xlu0 %1321 }
  0xdb   : > { %940 = vperm.xlu1 %4505, %v746_v49   ;;  %937 = vperm.xlu0 %4504, %v745_v50   ;;  %v768_v49 = vld [vmem:[%s6371_s4 + $0x1a8] sm:$0xff]  ;;  %v767_v50 = vld [vmem:[%s6371_s4 + $0x1a0] sm:$0xff] }
  0xde   : > { %v5123_v57 = vpop.permute.xlu0 %1327 }
  0xdf   : > { %946 = vperm.xlu1 %4505, %v748_v55   ;;  %943 = vperm.xlu0 %4504, %v747_v56   ;;  %v770_v56 = vld [vmem:[%s6371_s4 + $0x1b8] sm:$0xff] }
  0xe2   : > { %v5133_v61 = vpop.permute.xlu0 %1333 }
  0xe3   : > { %952 = vperm.xlu1 %4505, %v750_v58   ;;  %949 = vperm.xlu0 %4504, %v749_v59   ;;  %v769_v58 = vld [vmem:[%s6371_s4 + $0x1b0] sm:$0xff] }
  0xe6   : > { %v5141_v0 = vpop.permute.xlu0 %1339 }
  0xe7   : > { %958 = vperm.xlu1 %4505, %v752_v62   ;;  %955 = vperm.xlu0 %4504, %v751_v63   ;;  %v5227_v62 = vpop.permute.xlu1 %1318  ;;  %v772_v63 = vld [vmem:[%s6371_s4 + $0x1c8] sm:$0xff] }
  0xea   : > { %v5151_v6 = vpop.permute.xlu0 %1345 }
  0xeb   : > { %964 = vperm.xlu1 %4505, %v754_v3   ;;  %961 = vperm.xlu0 %4504, %v753_v5   ;;  %v771_v3 = vld [vmem:[%s6371_s4 + $0x1c0] sm:$0xff] }
  0xee   : > { %v5161_v12 = vpop.permute.xlu0 %1351 }
  0xef   : > { %970 = vperm.xlu1 %4505, %v756_v8   ;;  %967 = vperm.xlu0 %4504, %v755_v9   ;;  %v774_v8 = vld [vmem:[%s6371_s4 + $0x1d8] sm:$0xff]  ;;  %v773_v9 = vld [vmem:[%s6371_s4 + $0x1d0] sm:$0xff] }
  0xf2   : > { %v5169_v19 = vpop.permute.xlu0 %1357 }
  0xf3   : > { %976 = vperm.xlu1 %4505, %v758_v14   ;;  %973 = vperm.xlu0 %4504, %v757_v15   ;;  %v5243_v14 = vpop.permute.xlu1 %1324 }
  0xf6   : > { %v5179_v26 = vpop.permute.xlu0 %1363 }
  0xf7   : > { %6378 = vst [vmem:[#allocation11_spill] sm:$0xff] %v5179_v26  ;;  %982 = vperm.xlu1 %4505, %v760_v22   ;;  %979 = vperm.xlu0 %4504, %v759_v23  }
  0xfa   : > { %v5189_v33 = vpop.permute.xlu0 %1369 }
  0xfb   : > { %6379 = vst [vmem:[#allocation12_spill] sm:$0xff] %v5189_v33  ;;  %988 = vperm.xlu1 %4505, %v762_v27   ;;  %985 = vperm.xlu0 %4504, %v761_v30   ;;  %v776_v27 = vld [vmem:[%s6371_s4 + $0x1e8] sm:$0xff]  ;;  %v775_v30 = vld [vmem:[%s6371_s4 + $0x1e0] sm:$0xff] }
  0xfe   : > { %v5197_v38 = vpop.permute.xlu0 %1375 }
  0xff   : > { %6380 = vst [vmem:[#allocation13_spill] sm:$0xff] %v5197_v38  ;;  %994 = vperm.xlu1 %4505, %v764_v34   ;;  %991 = vperm.xlu0 %4504, %v763_v37  }
 0x102   : > { %v5207_v46 = vpop.permute.xlu0 %1381 }
 0x103   : > { %6381 = vst [vmem:[#allocation14_spill] sm:$0xff] %v5207_v46  ;;  %1000 = vperm.xlu1 %4505, %v766_v42   ;;  %997 = vperm.xlu0 %4504, %v765_v45   ;;  %v5259_v45 = vpop.permute.xlu1 %1330 }
 0x106   : > { %v5217_v55 = vpop.permute.xlu0 %1387 }
 0x107   : > { %6382 = vst [vmem:[#allocation15_spill] sm:$0xff] %v5217_v55  ;;  %1006 = vperm.xlu1 %4505, %v768_v49   ;;  %1003 = vperm.xlu0 %4504, %v767_v50   ;;  %v778_v50 = vld [vmem:[%s6371_s4 + $0x1f8] sm:$0xff] }
 0x10a   : > { %v5225_v59 = vpop.permute.xlu0 %1393 }
 0x10b   : > { %6383 = vst [vmem:[#allocation16_spill] sm:$0xff] %v5225_v59  ;;  %1012 = vperm.xlu1 %4505, %v770_v56   ;;  %1009 = vperm.xlu0 %4504, %v769_v58   ;;  %v777_v56 = vld [vmem:[%s6371_s4 + $0x1f0] sm:$0xff] }
 0x10e   : > { %v5235_v5 = vpop.permute.xlu0 %1399 }
 0x10f   : > { %6384 = vst [vmem:[#allocation17_spill] sm:$0xff] %v5235_v5  ;;  %1018 = vperm.xlu1 %4505, %v772_v63   ;;  %1015 = vperm.xlu0 %4504, %v771_v3  }
 0x112   : > { %v5245_v15 = vpop.permute.xlu0 %1405 }
 0x113   : > { %6385 = vst [vmem:[#allocation18_spill] sm:$0xff] %v5245_v15  ;;  %1024 = vperm.xlu1 %4505, %v774_v8   ;;  %1021 = vperm.xlu0 %4504, %v773_v9   ;;  %v553_v22 = vpop.f32.mrb[0].mxu0  ;;  %v2693_v8 = vld [vmem:[%s6370_s3 + $0x8] sm:$0xff]  ;;  %v2692_v9 = vld [vmem:[%s6370_s3] sm:$0xff] }
 0x114   : > { %v5247_v23 = vpop.f32.mrb[1].mxu0 }
 0x115   : > { %6386 = vst [vmem:[#allocation19_spill] sm:$0xff] %v5247_v23  ;;  %v557_v34 = vpop.f32.mrb[2].mxu0 }
 0x116   : > { %v5255_v37 = vpack.c.bf16 %v557_v34, %v553_v22  ;;  %v5257_v42 = vpop.permute.xlu0 %1411  ;;  %v5261_v49 = vpop.f32.mrb[3].mxu0 }
 0x117   : > { %6387 = vst [vmem:[#allocation20_spill] sm:$0xff] %v5257_v42  ;;  %6388 = vst [vmem:[#allocation21_spill] sm:$0xff] %v5261_v49  ;;  %1030 = vperm.xlu1 %4505, %v776_v27   ;;  %1027 = vperm.xlu0 %4504, %v775_v30   ;;  %v5279_v22 = vpop.permute.xlu1 %1336 }
 0x11a   : > { %v5269_v58 = vpop.permute.xlu0 %1417 }
 0x11b   : > { %6389 = vst [vmem:[#allocation22_spill] sm:$0xff] %v5269_v58  ;;  %1036 = vperm.xlu1 %4505, %v778_v50   ;;  %1033 = vperm.xlu0 %4504, %v777_v56   ;;  %v563_v63 = vpop.f32.mrb[4].mxu0  ;;  %v2695_v56 = vld [vmem:[%s6370_s3 + $0x18] sm:$0xff] }
 0x11c   : > { %v5271_v3 = vpop.f32.mrb[5].mxu0 }
 0x11d   : > { %6390 = vst [vmem:[#allocation23_spill] sm:$0xff] %v5271_v3  ;;  %v567_v27 = vpop.f32.mrb[6].mxu0  ;;  %v5295_v3 = vpop.permute.xlu1 %1342 }
 0x11e   : > { %v5281_v30 = vpack.c.bf16 %v567_v27, %v563_v63  ;;  %v5283_v34 = vpop.permute.xlu0 %847  ;;  %v5285_v50 = vpop.f32.mrb[7].mxu0 }
 0x11f   : > { %6391 = vst [vmem:[#allocation24_spill] sm:$0xff] %v5283_v34  ;;  %6392 = vst [vmem:[#allocation25_spill] sm:$0xff] %v5285_v50  ;;  %2715 = vperm.xlu1 %4505, %v2693_v8   ;;  %2710 = vperm.xlu0 %4504, %v2692_v9   ;;  %v2697_v8 = vld [vmem:[%s6370_s3 + $0x28] sm:$0xff]  ;;  %v2696_v9 = vld [vmem:[%s6370_s3 + $0x20] sm:$0xff] }
 0x122   : > { %v5293_v54 = vpop.permute.xlu0 %853 }
 0x123   : > { %6393 = vst [vmem:[#allocation26_spill] sm:$0xff] %v5293_v54  ;;  %2725 = vperm.xlu1 %4505, %v2695_v56   ;;  %2720 = vperm.xlu0 %4504, %v2694_v40   ;;  %v573_v63 = vpop.f32.mrb[8].mxu0  ;;  %v2699_v40 = vld [vmem:[%s6370_s3 + $0x38] sm:$0xff]  ;;  %v2698_v56 = vld [vmem:[%s6370_s3 + $0x30] sm:$0xff] }
 0x124   : > { %v5297_v27 = vpop.f32.mrb[9].mxu0 }
 0x125   : > { %6394 = vst [vmem:[#allocation27_spill] sm:$0xff] %v5297_v27  ;;  %v577_v50 = vpop.f32.mrb[10].mxu0  ;;  %v5317_v27 = vpop.permute.xlu1 %1348 }
 0x126   : > { %v5305_v49 = vpack.c.bf16 %v577_v50, %v573_v63  ;;  %v5307_v23 = vpop.permute.xlu0 %859  ;;  %v5309_v54 = vpop.f32.mrb[11].mxu0 }
 0x127   : > { %6395 = vst [vmem:[#allocation28_spill] sm:$0xff] %v5307_v23  ;;  %6396 = vst [vmem:[#allocation29_spill] sm:$0xff] %v5309_v54  ;;  %2735 = vperm.xlu1 %4505, %v2697_v8   ;;  %2730 = vperm.xlu0 %4504, %v2696_v9   ;;  %v2701_v8 = vld [vmem:[%s6370_s3 + $0x48] sm:$0xff]  ;;  %v2700_v9 = vld [vmem:[%s6370_s3 + $0x40] sm:$0xff] }
 0x129   : > { %v5333_v42 = vpop.permute.xlu1 %1354 }
 0x12a   : > { %v5319_v34 = vpop.permute.xlu0 %865 }
 0x12b   : > { %6397 = vst [vmem:[#allocation30_spill] sm:$0xff] %v5319_v34  ;;  %2745 = vperm.xlu1 %4505, %v2699_v40   ;;  %2740 = vperm.xlu0 %4504, %v2698_v56   ;;  %v583_v50 = vpop.f32.mrb[12].mxu0  ;;  %v2703_v56 = vld [vmem:[%s6370_s3 + $0x58] sm:$0xff] }
 0x12c   : > { %v5321_v63 = vpop.f32.mrb[13].mxu0 }
 0x12d   : > { %6398 = vst [vmem:[#allocation31_spill] sm:$0xff] %v5321_v63  ;;  %v587_v54 = vpop.f32.mrb[14].mxu0  ;;  %v2702_v63 = vld [vmem:[%s6370_s3 + $0x50] sm:$0xff] }
 0x12e   : > { %v5329_v23 = vpack.c.bf16 %v587_v54, %v583_v50  ;;  %v5331_v58 = vpop.permute.xlu0 %871  ;;  %v5335_v40 = vpop.f32.mrb[15].mxu0 }
 0x12f   : > { %6399 = vst [vmem:[#allocation32_spill] sm:$0xff] %v5331_v58  ;;  %6400 = vst [vmem:[#allocation33_spill] sm:$0xff] %v5335_v40  ;;  %2755 = vperm.xlu1 %4505, %v2701_v8   ;;  %2750 = vperm.xlu0 %4504, %v2700_v9   ;;  %v2705_v8 = vld [vmem:[%s6370_s3 + $0x68] sm:$0xff]  ;;  %v2704_v9 = vld [vmem:[%s6370_s3 + $0x60] sm:$0xff]  ;;  %v5353_v40 = vpop.permute.xlu1 %1360 }
 0x130   : > { %6403 = vst [vmem:[#allocation36_spill] sm:$0xff] %v5353_v40 }
 0x132   : > { %v5343_v34 = vpop.permute.xlu0 %877 }
 0x133   : > { %6401 = vst [vmem:[#allocation34_spill] sm:$0xff] %v5343_v34  ;;  %2765 = vperm.xlu1 %4505, %v2703_v56   ;;  %2760 = vperm.xlu0 %4504, %v2702_v63   ;;  %v593_v54 = vpop.f32.mrb[16].mxu0  ;;  %v2707_v63 = vld [vmem:[%s6370_s3 + $0x78] sm:$0xff]  ;;  %v5369_v59 = vpop.permute.xlu1 %1366 }
 0x134   : > { %v5345_v50 = vpop.f32.mrb[17].mxu0  ;;  %6407 = vst [vmem:[#allocation40_spill] sm:$0xff] %v5369_v59 }
 0x135   : > { %6402 = vst [vmem:[#allocation35_spill] sm:$0xff] %v5345_v50  ;;  %v597_v58 = vpop.f32.mrb[18].mxu0  ;;  %v2706_v50 = vld [vmem:[%s6370_s3 + $0x70] sm:$0xff] }
 0x136   : > { %v5355_v15 = vpack.c.bf16 %v597_v58, %v593_v54  ;;  %v5357_v5 = vpop.permute.xlu0 %883  ;;  %v5359_v56 = vpop.f32.mrb[19].mxu0 }
 0x137   : > { %6404 = vst [vmem:[#allocation37_spill] sm:$0xff] %v5357_v5  ;;  %6405 = vst [vmem:[#allocation38_spill] sm:$0xff] %v5359_v56  ;;  %2775 = vperm.xlu1 %4505, %v2705_v8   ;;  %2770 = vperm.xlu0 %4504, %v2704_v9  }
 0x13a   : > { %v5367_v34 = vpop.permute.xlu0 %889 }
 0x13b   : > { %6406 = vst [vmem:[#allocation39_spill] sm:$0xff] %v5367_v34  ;;  %2785 = vperm.xlu1 %4505, %v2707_v63   ;;  %2780 = vperm.xlu0 %4504, %v2706_v50   ;;  %v603_v58 = vpop.f32.mrb[20].mxu0 }
 0x13c   : > { %v5371_v54 = vpop.f32.mrb[21].mxu0 }
 0x13d   : > { %6408 = vst [vmem:[#allocation41_spill] sm:$0xff] %v5371_v54  ;;  %v607_v56 = vpop.f32.mrb[22].mxu0 }
 0x13e   : > { %v5373_v8 = vpack.c.bf16 %v607_v56, %v603_v58  ;;  %v5375_v9 = vpop.permute.xlu0 %895  ;;  %v5377_v5 = vpop.f32.mrb[23].mxu0 }
 0x13f   : > { %6409 = vst [vmem:[#allocation42_spill] sm:$0xff] %v5375_v9  ;;  %6410 = vst [vmem:[#allocation43_spill] sm:$0xff] %v5377_v5 }
 0x142   : > { %v5379_v55 = vpop.permute.xlu0 %901 }
 0x143   : > { %6411 = vst [vmem:[#allocation44_spill] sm:$0xff] %v5379_v55  ;;  %v613_v46 = vpop.f32.mrb[24].mxu0 }
 0x144   : > { %v5381_v38 = vpop.f32.mrb[25].mxu0 }
 0x145   : > { %6412 = vst [vmem:[#allocation45_spill] sm:$0xff] %v5381_v38  ;;  %v617_v34 = vpop.f32.mrb[26].mxu0 }
 0x146   : > { %v5383_v33 = vpack.c.bf16 %v617_v34, %v613_v46  ;;  %v5385_v63 = vpop.permute.xlu0 %907  ;;  %v5387_v50 = vpop.f32.mrb[27].mxu0 }
 0x147   : > { %6413 = vst [vmem:[#allocation46_spill] sm:$0xff] %v5385_v63  ;;  %6414 = vst [vmem:[#allocation47_spill] sm:$0xff] %v5387_v50 }
 0x14a   : > { %v5389_v54 = vpop.permute.xlu0 %913 }
 0x14b   : > { %v623_v56 = vpop.f32.mrb[28].mxu0 }
 0x14c   : > { %v5391_v58 = vpop.f32.mrb[29].mxu0 }
 0x14d   : > { %v627_v9 = vpop.f32.mrb[30].mxu0 }
 0x14e   : > { %v5393_v59 = vpack.c.bf16 %v627_v9, %v623_v56  ;;  %v5395_v5 = vpop.permute.xlu0 %919  ;;  %v5397_v55 = vpop.f32.mrb[31].mxu0  ;;  %v6416_v9 = vmov 0.0  }
 0x14f   : > { %6415 = vst [vmem:[#allocation48_spill] sm:$0xff] %v5397_v55  ;;  %v3479_v56 = vsel %vm1424_vm3, 1.0, %v6416_v9  ;;  %v3480_v17 = vsel %vm1425_vm5, 1.0, %v6416_v9  ;;  %v3481_v24 = vsel %vm1426_vm6, 1.0, %v6416_v9  ;;  %v3483_v29 = vsel %vm1428_vm8, 1.0, %v6416_v9 }
 0x150   : > { %v3485_v35 = vsel %vm1430_vm10, 1.0, %v6416_v9  ;;  %v3487_v18 = vsel %vm1432_vm12, 1.0, %v6416_v9  ;;  %v3489_v47 = vsel %vm1434_vm14, 1.0, %v6416_v9  ;;  %v3491_v53 = vsel %vm1436_vm0, 1.0, %v6416_v9 }
 0x151   : > { %vm1438_vm3 = vcmp.eq.s32.totalorder %v5042_v25, %v5091_v44  ;;  %vm1440_vm5 = vcmp.eq.s32.totalorder %v5050_v28, %v5091_v44  ;;  %vm1441_vm6 = vcmp.eq.s32.totalorder %v5159_v11, %v5091_v44  ;;  %vm1443_vm8 = vcmp.eq.s32.totalorder %v5171_v20, %v5091_v44 }
 0x152   : > { %v5399_v38 = vpop.permute.xlu0 %925  ;;  %v3493_v60 = vsel %vm1438_vm3, 1.0, %v6416_v9  ;;  %vm1445_vm10 = vcmp.eq.s32.totalorder %v5187_v31, %v5091_v44  ;;  %vm1447_vm12 = vcmp.eq.s32.totalorder %v5199_v41, %v5091_v44  ;;  %vm1449_vm14 = vcmp.eq.s32.totalorder %v5215_v51, %v5091_v44 }
 0x153   : > { %v706_v46 = vpop.f32.mrb[32].mxu0  ;;  %v3502_v31 = vsel %vm1447_vm12, 1.0, %v6416_v9  ;;  %vm1451_vm0 = vcmp.eq.s32.totalorder %v5227_v62, %v5091_v44  ;;  %vm1453_vm3 = vcmp.eq.s32.totalorder %v5243_v14, %v5091_v44  ;;  %vm1461_vm12 = vcmp.eq.s32.totalorder %v5317_v27, %v5091_v44  ;;  %v6418_v27 = vld [vmem:[#allocation36_spill] sm:$0xff] }
 0x154   : > { %v4073_v34 = vpop.f32.mrb[33].mxu0  ;;  %v3508_v14 = vsel %vm1453_vm3, 1.0, %v6416_v9 }
 0x155   : > { %v709_v26 = vpop.f32.mrb[34].mxu0  ;;  %v3478_v34 = vsel %vm1423_vm4, 1.0, %v6416_v9  ;;  %vm1439_vm4 = vcmp.eq.s32.totalorder %v5143_v2, %v5091_v44  ;;  %v3495_v2 = vsel %vm1440_vm5, 1.0, %v6416_v9  ;;  %vm1455_vm5 = vcmp.eq.s32.totalorder %v5259_v45, %v5091_v44 }
 0x156   : > { %v4303_v63 = vpack.c.bf16 %v709_v26, %v706_v46  ;;  %v5401_v40 = vpop.permute.xlu0 %931  ;;  %v4074_v50 = vpop.f32.mrb[35].mxu0  ;;  %v3482_v26 = vsel %vm1427_vm7, 1.0, %v6416_v9  ;;  %v3492_v46 = vsel %vm1437_vm1, 1.0, %v6416_v9  ;;  %vm1442_vm7 = vcmp.eq.s32.totalorder %v5060_v32, %v5091_v44 }
 0x157   : > { %v3497_v11 = vsel %vm1442_vm7, 1.0, %v6416_v9  ;;  %vm1452_vm1 = vcmp.eq.s32.totalorder %v5113_v52, %v5091_v44  ;;  %v5598_v52 = vld [vmem:[%s6373_s6] sm:$0xf]  ;;  %vm1457_vm7 = vcmp.eq.s32.totalorder %v5279_v22, %v5091_v44 }
 0x158   : > { %4304 = vmatprep.subr.bf16.mxu1 %v4303_v63  ;;  %v3507_v62 = vsel %vm1452_vm1, 1.0, %v6416_v9 }
 0x159   : > { %4306 = vmatpush3.bf16.msra.mxu1 %v4303_v63  ;;  %v3486_v63 = vsel %vm1431_vm11, 1.0, %v6416_v9  ;;  %vm1446_vm11 = vcmp.eq.s32.totalorder %v5078_v39, %v5091_v44 }
 0x15a   : > { %v5408_v55 = vpop.permute.xlu0 %937  ;;  %4308 = vmatprep.subr.bf16.mxu1 %v5255_v37 }
 0x15c   : > { %4080 = vmatmul.mubr.msk.f32.vlgmr.msra.gmra.mrb[0].mxu1 %vm1632_vm2, %v3478_v34 }
 0x15d   : > { %4082 = vmatprep.mubr.msk.f32.mxu1 %vm1632_vm2, %v3479_v56  ;;  %4310 = vmatpush3.bf16.msra.mxu1 %v5255_v37  ;;  %v5438_v37 = vpop.permute.xlu1 %1372 }
 0x15e   : > { %v5419_v1 = vpop.permute.xlu0 %943  ;;  %4312 = vmatprep.subr.bf16.mxu1 %v5281_v30 }
 0x160   : > { %4083 = vmatmul.mubr.msk.f32.gmra.mrb[2].mxu1 %vm1632_vm2, %v3480_v17  ;;  %v3498_v17 = vsel %vm1443_vm8, 1.0, %v6416_v9 }
 0x161   : > { %4085 = vmatprep.mubr.msk.f32.mxu1 %vm1632_vm2, %v3481_v24  ;;  %4314 = vmatpush3.bf16.msra.mxu1 %v5281_v30  ;;  %v3484_v30 = vsel %vm1429_vm9, 1.0, %v6416_v9  ;;  %v5457_v10 = vpop.permute.xlu1 %1378  ;;  %vm1444_vm9 = vcmp.eq.s32.totalorder %v5070_v36, %v5091_v44  ;;  %v3500_v24 = vsel %vm1445_vm10, 1.0, %v6416_v9  ;;  %vm1459_vm10 = vcmp.eq.s32.totalorder %v5295_v3, %v5091_v44 }
 0x162   : > { %v5431_v4 = vpop.permute.xlu0 %949  ;;  %4316 = vmatprep.subr.bf16.mxu1 %v5305_v49  ;;  %v3499_v20 = vsel %vm1444_vm9, 1.0, %v6416_v9  ;;  %vm1458_vm9 = vcmp.eq.s32.totalorder %v5141_v0, %v5091_v44  ;;  %v3514_v0 = vsel %vm1459_vm10, 1.0, %v6416_v9 }
 0x163   : > { %v3513_v22 = vsel %vm1458_vm9, 1.0, %v6416_v9 }
 0x164   : > { %4086 = vmatmul.mubr.msk.f32.gmra.mrb[4].mxu1 %vm1632_vm2, %v3482_v26  ;;  %v3501_v26 = vsel %vm1446_vm11, 1.0, %v6416_v9  ;;  %vm1460_vm11 = vcmp.eq.s32.totalorder %v5151_v6, %v5091_v44  ;;  %v3516_v6 = vsel %vm1461_vm12, 1.0, %v6416_v9 }
 0x165   : > { %4088 = vmatprep.mubr.msk.f32.mxu1 %vm1632_vm2, %v3483_v29  ;;  %4318 = vmatpush3.bf16.msra.mxu1 %v5305_v49  ;;  %v5478_v50 = vpop.permute.xlu1 %1384 }
 0x166   : > { %v5445_v7 = vpop.permute.xlu0 %955  ;;  %4320 = vmatprep.subr.bf16.mxu1 %v5329_v23  ;;  %vm1473_vm9 = vcmp.eq.s32.totalorder %v5478_v50, %v5091_v44  ;;  %v6425_v50 = vld [vmem:[#allocation16_spill] sm:$0xff] }
 0x167   : > { %vm1476_vm12 = vcmp.eq.s32.totalorder %v6425_v50, %v5091_v44  ;;  %v6440_v50 = vld [vmem:[#allocation46_spill] sm:$0xff] }
 0x168   : > { %4089 = vmatmul.mubr.msk.f32.gmra.mrb[6].mxu1 %vm1632_vm2, %v3484_v30 }
 0x169   : > { %4091 = vmatprep.mubr.msk.f32.mxu1 %vm1632_vm2, %v3485_v35  ;;  %4322 = vmatpush3.bf16.msra.mxu1 %v5329_v23  ;;  %v3488_v23 = vsel %vm1433_vm13, 1.0, %v6416_v9  ;;  %v5497_v21 = vpop.permute.xlu1 %1390  ;;  %vm1448_vm13 = vcmp.eq.s32.totalorder %v5088_v43, %v5091_v44  ;;  %v3504_v35 = vsel %vm1449_vm14, 1.0, %v6416_v9  ;;  %vm1463_vm14 = vcmp.eq.s32.totalorder %v5333_v42, %v5091_v44  ;;  %v6419_v42 = vld [vmem:[#allocation11_spill] sm:$0xff] }
 0x16a   : > { %v5459_v49 = vpop.permute.xlu0 %961  ;;  %4324 = vmatprep.subr.bf16.mxu1 %v5355_v15  ;;  %v3503_v41 = vsel %vm1448_vm13, 1.0, %v6416_v9  ;;  %vm1462_vm13 = vcmp.eq.s32.totalorder %v5161_v12, %v5091_v44  ;;  %v3518_v12 = vsel %vm1463_vm14, 1.0, %v6416_v9  ;;  %vm1466_vm1 = vcmp.eq.s32.totalorder %v6419_v42, %v5091_v44 }
 0x16c   : > { %4092 = vmatmul.mubr.msk.f32.gmra.mrb[8].mxu1 %vm1632_vm2, %v3486_v63  ;;  %v6417_v63 = vlaneseq }
 0x16d   : > { %4094 = vmatprep.mubr.msk.f32.mxu1 %vm1632_vm2, %v3487_v18  ;;  %4326 = vmatpush3.bf16.msra.mxu1 %v5355_v15  ;;  %v3490_v15 = vsel %vm1435_vm15, 1.0, %v6416_v9  ;;  %v5517_v56 = vpop.permute.xlu1 %1396  ;;  %vm1450_vm15 = vcmp.eq.s32.totalorder %v5101_v48, %v5091_v44 }
 0x16e   : > { %v5471_v13 = vpop.permute.xlu0 %967  ;;  %4328 = vmatprep.subr.bf16.mxu1 %v5373_v8  ;;  %v3505_v51 = vsel %vm1450_vm15, 1.0, %v6416_v9  ;;  %v5577_v18 = vshrl.u32 %v6417_v63, 7  ;;  %vm1464_vm15 = vcmp.eq.s32.totalorder %v5169_v19, %v5091_v44 }
 0x170   : > { %4095 = vmatmul.mubr.msk.f32.gmra.mrb[10].mxu1 %vm1632_vm2, %v3488_v23  ;;  %v3506_v23 = vsel %vm1451_vm0, 1.0, %v6416_v9  ;;  %vm1465_vm0 = vcmp.eq.s32.totalorder %v6418_v27, %v5091_v44 }
 0x171   : > { %4097 = vmatprep.mubr.msk.f32.mxu1 %vm1632_vm2, %v3489_v47  ;;  %4330 = vmatpush3.bf16.msra.mxu1 %v5373_v8  ;;  %v5533_v34 = vpop.permute.xlu1 %1402  ;;  %v3520_v19 = vsel %vm1465_vm0, 1.0, %v6416_v9 }
 0x172   : > { %v5485_v16 = vpop.permute.xlu0 %973  ;;  %4332 = vmatprep.subr.bf16.mxu1 %v5383_v33 }
 0x174   : > { %4098 = vmatmul.mubr.msk.f32.gmra.mrb[12].mxu1 %vm1632_vm2, %v3490_v15  ;;  %v2618_v15 = vsub.s32 1, %v5577_v18 }
 0x175   : > { %4100 = vmatprep.mubr.msk.f32.mxu1 %vm1632_vm2, %v3491_v53  ;;  %4334 = vmatpush3.bf16.msra.mxu1 %v5383_v33  ;;  %v3494_v33 = vsel %vm1439_vm4, 1.0, %v6416_v9  ;;  %v5551_v29 = vpop.permute.xlu1 %1408  ;;  %vm1454_vm4 = vcmp.eq.s32.totalorder %v5123_v57, %v5091_v44 }
 0x176   : > { %v5499_v8 = vpop.permute.xlu0 %979  ;;  %4336 = vmatprep.subr.bf16.mxu1 %v5393_v59  ;;  %v5608_v57 = vrot.slane %v5598_v52, %v2618_v15 }
 0x178   : > { %4101 = vmatmul.mubr.msk.f32.gmra.mrb[14].mxu1 %vm1632_vm2, %v3492_v46  ;;  %v3509_v46 = vsel %vm1454_vm4, 1.0, %v6416_v9  ;;  %vm2629_vm8 = vcmp.eq.s32.totalorder %v5608_v57, %v5577_v18 }
 0x179   : > { %4103 = vmatprep.mubr.msk.f32.mxu1 %vm1632_vm2, %v3493_v60  ;;  %4338 = vmatpush3.bf16.msra.mxu1 %v5393_v59  ;;  %v3496_v59 = vsel %vm1441_vm6, 1.0, %v6416_v9  ;;  %v5567_v30 = vpop.permute.xlu1 %1414  ;;  %vm1456_vm6 = vcmp.eq.s32.totalorder %v5133_v61, %v5091_v44 }
 0x17a   : > { %v5511_v25 = vpop.permute.xlu0 %985  ;;  %v3511_v45 = vsel %vm1456_vm6, 1.0, %v6416_v9 }
 0x17c   : > { %4104 = vmatmul.mubr.msk.f32.gmra.mrb[16].mxu1 %vm1632_vm2, %v3494_v33 }
 0x17d   : > { %4106 = vmatprep.mubr.msk.f32.mxu1 %vm1632_vm2, %v3495_v2  ;;  %v5588_v47 = vpop.permute.xlu1 %1420  ;;  %v3510_v2 = vsel %vm1455_vm5, 1.0, %v6416_v9  ;;  %vm1469_vm5 = vcmp.eq.s32.totalorder %v5438_v37, %v5091_v44  ;;  %v6423_v37 = vld [vmem:[#allocation14_spill] sm:$0xff] }
 0x17e   : > { %v5523_v28 = vpop.permute.xlu0 %991  ;;  %v3524_v15 = vsel %vm1469_vm5, 1.0, %v6416_v9 }
 0x180   : > { %4107 = vmatmul.mubr.msk.f32.gmra.mrb[18].mxu1 %vm1632_vm2, %v3496_v59  ;;  %v3512_v59 = vsel %vm1457_vm7, 1.0, %v6416_v9  ;;  %vm1471_vm7 = vcmp.eq.s32.totalorder %v5457_v10, %v5091_v44  ;;  %v6424_v10 = vld [vmem:[#allocation15_spill] sm:$0xff] }
 0x181   : > { %4109 = vmatprep.mubr.msk.f32.mxu1 %vm1632_vm2, %v3497_v11  ;;  %v5613_v60 = vpop.permute.xlu1 %850  ;;  %vm1474_vm10 = vcmp.eq.s32.totalorder %v6424_v10, %v5091_v44 }
 0x182   : > { %v5535_v32 = vpop.permute.xlu0 %997 }
 0x184   : > { %4110 = vmatmul.mubr.msk.f32.gmra.mrb[20].mxu1 %vm1632_vm2, %v3498_v17  ;;  %v3515_v17 = vsel %vm1460_vm11, 1.0, %v6416_v9  ;;  %vm1475_vm11 = vcmp.eq.s32.totalorder %v5497_v21, %v5091_v44  ;;  %v6426_v21 = vld [vmem:[#allocation17_spill] sm:$0xff] }
 0x185   : > { %4112 = vmatprep.mubr.msk.f32.mxu1 %vm1632_vm2, %v3499_v20  ;;  %v5634_v11 = vpop.permute.xlu1 %856  ;;  %v3517_v20 = vsel %vm1462_vm13, 1.0, %v6416_v9  ;;  %vm1477_vm13 = vcmp.eq.s32.totalorder %v5517_v56, %v5091_v44  ;;  %vm1478_vm14 = vcmp.eq.s32.totalorder %v6426_v21, %v5091_v44  ;;  %v6427_v56 = vld [vmem:[#allocation18_spill] sm:$0xff] }
 0x186   : > { %v5545_v36 = vpop.permute.xlu0 %1003  ;;  %v3533_v27 = vsel %vm1478_vm14, 1.0, %v6416_v9  ;;  %vm1480_vm0 = vcmp.eq.s32.totalorder %v6427_v56, %v5091_v44 }
 0x188   : > { %4113 = vmatmul.mubr.msk.f32.gmra.mrb[22].mxu1 %vm1632_vm2, %v3500_v24  ;;  %v3519_v24 = vsel %vm1464_vm15, 1.0, %v6416_v9  ;;  %vm1479_vm15 = vcmp.eq.s32.totalorder %v5533_v34, %v5091_v44  ;;  %v6428_v34 = vld [vmem:[#allocation20_spill] sm:$0xff] }
 0x189   : > { %4115 = vmatprep.mubr.msk.f32.mxu1 %vm1632_vm2, %v3501_v26  ;;  %v5648_v3 = vpop.permute.xlu1 %862  ;;  %v3534_v42 = vsel %vm1479_vm15, 1.0, %v6416_v9 }
 0x18a   : > { %v5557_v39 = vpop.permute.xlu0 %1009 }
 0x18c   : > { %4116 = vmatmul.mubr.msk.f32.gmra.mrb[24].mxu1 %vm1632_vm2, %v3502_v31  ;;  %v6420_v31 = vld [vmem:[#allocation40_spill] sm:$0xff] }
 0x18d   : > { %4118 = vmatprep.mubr.msk.f32.mxu1 %vm1632_vm2, %v3503_v41  ;;  %v5662_v26 = vpop.permute.xlu1 %868  ;;  %vm1467_vm3 = vcmp.eq.s32.totalorder %v6420_v31, %v5091_v44  ;;  %v3521_v41 = vsel %vm1466_vm1, 1.0, %v6416_v9  ;;  %vm1481_vm1 = vcmp.eq.s32.totalorder %v5551_v29, %v5091_v44  ;;  %v6429_v29 = vld [vmem:[#allocation22_spill] sm:$0xff] }
 0x18e   : > { %v5569_v43 = vpop.permute.xlu0 %1015  ;;  %v3522_v63 = vsel %vm1467_vm3, 1.0, %v6416_v9  ;;  %vm1482_vm3 = vcmp.eq.s32.totalorder %v6428_v34, %v5091_v44  ;;  %v3536_v31 = vsel %vm1481_vm1, 1.0, %v6416_v9  ;;  %vm1484_vm5 = vcmp.eq.s32.totalorder %v6429_v29, %v5091_v44 }
 0x190   : > { %4119 = vmatmul.mubr.msk.f32.gmra.mrb[26].mxu1 %vm1632_vm2, %v3504_v35  ;;  %v6421_v35 = vld [vmem:[#allocation12_spill] sm:$0xff] }
 0x191   : > { %4121 = vmatprep.mubr.msk.f32.mxu1 %vm1632_vm2, %v3505_v51  ;;  %vm1468_vm4 = vcmp.eq.s32.totalorder %v6421_v35, %v5091_v44  ;;  %v5676_v51 = vpop.permute.xlu1 %874 }
 0x192   : > { %v5582_v48 = vpop.permute.xlu0 %1021  ;;  %vm1047_vm15 = vcmp.eq.s32.totalorder %v5676_v51, %v5091_v44  ;;  %v6437_v51 = vld [vmem:[#allocation39_spill] sm:$0xff] }
 0x194   : > { %4122 = vmatmul.mubr.msk.f32.gmra.mrb[28].mxu1 %vm1632_vm2, %v3506_v23  ;;  %v3523_v23 = vsel %vm1468_vm4, 1.0, %v6416_v9  ;;  %vm1483_vm4 = vcmp.eq.s32.totalorder %v5567_v30, %v5091_v44 }
 0x195   : > { %4124 = vmatprep.mubr.msk.f32.mxu1 %vm1632_vm2, %v3507_v62  ;;  %v6422_v62 = vld [vmem:[#allocation13_spill] sm:$0xff] }
 0x196   : > { %v5600_v53 = vpop.permute.xlu0 %1027  ;;  %vm1470_vm6 = vcmp.eq.s32.totalorder %v6422_v62, %v5091_v44 }
 0x198   : > { %4125 = vmatmul.mubr.msk.f32.gmra.mrb[30].mxu1 %vm1632_vm2, %v3508_v14  ;;  %v3525_v14 = vsel %vm1470_vm6, 1.0, %v6416_v9  ;;  %vm1485_vm6 = vcmp.eq.s32.totalorder %v5588_v47, %v5091_v44  ;;  %v6431_v47 = vld [vmem:[#allocation26_spill] sm:$0xff] }
 0x199   : > { %4127 = vmatprep.mubr.msk.f32.mxu1 %vm1632_vm2, %v3509_v46  ;;  %v5690_v46 = vpop.permute.xlu1 %880  ;;  %v3540_v62 = vsel %vm1485_vm6, 1.0, %v6416_v9 }
 0x19a   : > { %v5615_v33 = vpop.permute.xlu0 %1033  ;;  %vm1049_vm1 = vcmp.eq.s32.totalorder %v5690_v46, %v5091_v44  ;;  %v6438_v46 = vld [vmem:[#allocation42_spill] sm:$0xff] }
 0x19c   : > { %4128 = vmatmul.mubr.msk.f32.gmra.mrb[32].mxu1 %vm1632_vm2, %v3510_v2  ;;  %v3526_v2 = vsel %vm1471_vm7, 1.0, %v6416_v9 }
 0x19d   : > { %4130 = vmatprep.mubr.msk.f32.mxu1 %vm1632_vm2, %v3511_v45 }
 0x19e   : > { %v5627_v61 = vpop.permute.xlu0 %2710 }
 0x19f   : > { %3669 = vmatprep.mubr.msk.f32.mxu0 %vm2629_vm8, %v5627_v61  ;;  %vm1472_vm8 = vcmp.eq.s32.totalorder %v6423_v37, %v5091_v44 }
 0x1a0   : > { %4131 = vmatmul.mubr.msk.f32.gmra.mrb[34].mxu1 %vm1632_vm2, %v3512_v59  ;;  %v3527_v45 = vsel %vm1472_vm8, 1.0, %v6416_v9  ;;  %v5704_v59 = vpop.permute.xlu1 %886  ;;  %vm1039_vm8 = vcmp.eq.s32.totalorder %v5613_v60, %v5091_v44  ;;  %v6433_v60 = vld [vmem:[#allocation30_spill] sm:$0xff] }
 0x1a1   : > { %4133 = vmatprep.mubr.msk.f32.mxu1 %vm1632_vm2, %v3513_v22  ;;  %v3528_v22 = vsel %vm1473_vm9, 1.0, %v6416_v9  ;;  %vm1040_vm9 = vcmp.eq.s32.totalorder %v6431_v47, %v5091_v44 }
 0x1a4   : > { %4134 = vmatmul.mubr.msk.f32.gmra.mrb[36].mxu1 %vm1632_vm2, %v3514_v0  ;;  %v3529_v0 = vsel %vm1474_vm10, 1.0, %v6416_v9  ;;  %vm1041_vm10 = vcmp.eq.s32.totalorder %v5634_v11, %v5091_v44  ;;  %v6434_v11 = vld [vmem:[#allocation32_spill] sm:$0xff] }
 0x1a5   : > { %4136 = vmatprep.mubr.msk.f32.mxu1 %vm1632_vm2, %v3515_v17  ;;  %v3530_v17 = vsel %vm1475_vm11, 1.0, %v6416_v9  ;;  %vm1043_vm11 = vcmp.eq.s32.totalorder %v5648_v3, %v5091_v44  ;;  %vm1046_vm14 = vcmp.eq.s32.totalorder %v6434_v11, %v5091_v44  ;;  %v6435_v3 = vld [vmem:[#allocation34_spill] sm:$0xff] }
 0x1a8   : > { %4137 = vmatmul.mubr.msk.f32.gmra.mrb[38].mxu1 %vm1632_vm2, %v3516_v6  ;;  %v3531_v6 = vsel %vm1476_vm12, 1.0, %v6416_v9  ;;  %vm1044_vm12 = vcmp.eq.s32.totalorder %v6433_v60, %v5091_v44 }
 0x1a9   : > { %4139 = vmatprep.mubr.msk.f32.mxu1 %vm1632_vm2, %v3517_v20  ;;  %v5718_v20 = vpop.permute.xlu1 %892 }
 0x1aa   : > { %vm1053_vm6 = vcmp.eq.s32.totalorder %v5718_v20, %v5091_v44 }
 0x1ac   : > { %4140 = vmatmul.mubr.msk.f32.gmra.mrb[40].mxu1 %vm1632_vm2, %v3518_v12  ;;  %v3532_v12 = vsel %vm1477_vm13, 1.0, %v6416_v9  ;;  %vm1045_vm13 = vcmp.eq.s32.totalorder %v5662_v26, %v5091_v44  ;;  %v6436_v26 = vld [vmem:[#allocation37_spill] sm:$0xff] }
 0x1ad   : > { %4142 = vmatprep.mubr.msk.f32.mxu1 %vm1632_vm2, %v3519_v24  ;;  %v5732_v24 = vpop.permute.xlu1 %898 }
 0x1b0   : > { %4143 = vmatmul.mubr.msk.f32.gmra.mrb[42].mxu1 %vm1632_vm2, %v3520_v19  ;;  %v3535_v19 = vsel %vm1480_vm0, 1.0, %v6416_v9  ;;  %vm1048_vm0 = vcmp.eq.s32.totalorder %v6435_v3, %v5091_v44 }
 0x1b1   : > { %4145 = vmatprep.mubr.msk.f32.mxu1 %vm1632_vm2, %v3521_v41  ;;  %v3537_v41 = vsel %vm1482_vm3, 1.0, %v6416_v9  ;;  %v905_v35 = vpop.permute.xlu1 %904  ;;  %vm1050_vm3 = vcmp.eq.s32.totalorder %v6436_v26, %v5091_v44 }
 0x1b4   : > { %4146 = vmatmul.mubr.msk.f32.gmra.mrb[44].mxu1 %vm1632_vm2, %v3522_v63  ;;  %v3538_v63 = vsel %vm1483_vm4, 1.0, %v6416_v9  ;;  %vm1051_vm4 = vcmp.eq.s32.totalorder %v5704_v59, %v5091_v44  ;;  %v6439_v59 = vld [vmem:[#allocation44_spill] sm:$0xff] }
 0x1b5   : > { %4148 = vmatprep.mubr.msk.f32.mxu1 %vm1632_vm2, %v3523_v23  ;;  %v3539_v23 = vsel %vm1484_vm5, 1.0, %v6416_v9  ;;  %v911_v30 = vpop.permute.xlu1 %910  ;;  %v6432_v9 = vld [vmem:[#allocation28_spill] sm:$0xff]  ;;  %vm1052_vm5 = vcmp.eq.s32.totalorder %v6437_v51, %v5091_v44 }
 0x1b8   : > { %4149 = vmatmul.mubr.msk.f32.gmra.mrb[46].mxu1 %vm1632_vm2, %v3524_v15  ;;  %v6430_v15 = vld [vmem:[#allocation24_spill] sm:$0xff] }
 0x1b9   : > { %4151 = vmatprep.mubr.msk.f32.mxu1 %vm1632_vm2, %v3525_v14  ;;  %vm1038_vm7 = vcmp.eq.s32.totalorder %v6430_v15, %v5091_v44  ;;  %v4590_v14 = vmov 1.0   ;;  %v917_v37 = vpop.permute.xlu1 %916 }
 0x1bc   : > { %4152 = vmatmul.mubr.msk.f32.gmra.mrb[48].mxu1 %vm1632_vm2, %v3526_v2 }
 0x1bd   : > { %4154 = vmatprep.mubr.msk.f32.mxu1 %vm1632_vm2, %v3527_v45  ;;  %v923_v2 = vpop.permute.xlu1 %922 }
 0x1c0   : > { %4155 = vmatmul.mubr.msk.f32.gmra.mrb[50].mxu1 %vm1632_vm2, %v3528_v22 }
 0x1c1   : > { %4157 = vmatprep.mubr.msk.f32.mxu1 %vm1632_vm2, %v3529_v0  ;;  %v929_v45 = vpop.permute.xlu1 %928 }
 0x1c4   : > { %4158 = vmatmul.mubr.msk.f32.gmra.mrb[52].mxu1 %vm1632_vm2, %v3530_v17 }
 0x1c5   : > { %4160 = vmatprep.mubr.msk.f32.mxu1 %vm1632_vm2, %v3531_v6  ;;  %v935_v10 = vpop.permute.xlu1 %934 }
 0x1c8   : > { %4161 = vmatmul.mubr.msk.f32.gmra.mrb[54].mxu1 %vm1632_vm2, %v3532_v12 }
 0x1c9   : > { %4163 = vmatprep.mubr.msk.f32.mxu1 %vm1632_vm2, %v3533_v27  ;;  %v941_v22 = vpop.permute.xlu1 %940 }
 0x1cc   : > { %4164 = vmatmul.mubr.msk.f32.gmra.mrb[56].mxu1 %vm1632_vm2, %v3534_v42 }
 0x1cd   : > { %4166 = vmatprep.mubr.msk.f32.mxu1 %vm1632_vm2, %v3535_v19  ;;  %v947_v0 = vpop.permute.xlu1 %946 }
 0x1d0   : > { %4167 = vmatmul.mubr.msk.f32.gmra.mrb[58].mxu1 %vm1632_vm2, %v3536_v31 }
 0x1d1   : > { %4169 = vmatprep.mubr.msk.f32.mxu1 %vm1632_vm2, %v3537_v41  ;;  %v953_v17 = vpop.permute.xlu1 %952 }
 0x1d4   : > { %4170 = vmatmul.mubr.msk.f32.gmra.mrb[60].mxu1 %vm1632_vm2, %v3538_v63 }
 0x1d5   : > { %4172 = vmatprep.mubr.msk.f32.mxu1 %vm1632_vm2, %v3539_v23  ;;  %v959_v6 = vpop.permute.xlu1 %958 }
 0x1d8   : > { %4173 = vmatmul.mubr.msk.f32.gmra.mrb[62].mxu1 %vm1632_vm2, %v3540_v62  ;;  %vm1042_vm2 = vcmp.eq.s32.totalorder %v6432_v9, %v5091_v44 }
 0x1d9   : > { %4207 = vmatprep.mubr.msk.f32.mxu1 %vm1038_vm7, %v4590_v14  ;;  %vm1054_vm7 = vcmp.eq.s32.totalorder %v6438_v46, %v5091_v44 }
 0x1dc   : > { %4208 = vmatmul.mubr.msk.f32.vlgmr.msra.gmra.mrb[0].mxu1 %vm1039_vm8, %v4590_v14  ;;  %vm1055_vm8 = vcmp.eq.s32.totalorder %v5732_v24, %v5091_v44 }
 0x1dd   : > { %4210 = vmatprep.mubr.msk.f32.mxu1 %vm1040_vm9, %v4590_v14  ;;  %vm1056_vm9 = vcmp.eq.s32.totalorder %v6439_v59, %v5091_v44 }
 0x1e0   : > { %4211 = vmatmul.mubr.msk.f32.gmra.mrb[2].mxu1 %vm1041_vm10, %v4590_v14  ;;  %vm1057_vm10 = vcmp.eq.s32.totalorder %v905_v35, %v5091_v44 }
 0x1e1   : > { %4213 = vmatprep.mubr.msk.f32.mxu1 %vm1042_vm2, %v4590_v14  ;;  %vm1058_vm2 = vcmp.eq.s32.totalorder %v6440_v50, %v5091_v44 }
 0x1e4   : > { %4214 = vmatmul.mubr.msk.f32.gmra.mrb[4].mxu1 %vm1043_vm11, %v4590_v14  ;;  %vm1059_vm11 = vcmp.eq.s32.totalorder %v911_v30, %v5091_v44 }
 0x1e5   : > { %4216 = vmatprep.mubr.msk.f32.mxu1 %vm1044_vm12, %v4590_v14  ;;  %vm1060_vm12 = vcmp.eq.s32.totalorder %v5389_v54, %v5091_v44  ;;  %v965_v54 = vpop.permute.xlu1 %964 }
 0x1e8   : > { %4217 = vmatmul.mubr.msk.f32.gmra.mrb[6].mxu1 %vm1045_vm13, %v4590_v14  ;;  %vm1061_vm13 = vcmp.eq.s32.totalorder %v917_v37, %v5091_v44 }
 0x1e9   : > { %4219 = vmatprep.mubr.msk.f32.mxu1 %vm1046_vm14, %v4590_v14  ;;  %vm1062_vm14 = vcmp.eq.s32.totalorder %v5395_v5, %v5091_v44  ;;  %v971_v5 = vpop.permute.xlu1 %970 }
 0x1ec   : > { %4220 = vmatmul.mubr.msk.f32.gmra.mrb[8].mxu1 %vm1047_vm15, %v4590_v14  ;;  %vm1063_vm15 = vcmp.eq.s32.totalorder %v923_v2, %v5091_v44 }
 0x1ed   : > { %4222 = vmatprep.mubr.msk.f32.mxu1 %vm1048_vm0, %v4590_v14  ;;  %vm1064_vm0 = vcmp.eq.s32.totalorder %v5399_v38, %v5091_v44  ;;  %v977_v38 = vpop.permute.xlu1 %976 }
 0x1f0   : > { %4223 = vmatmul.mubr.msk.f32.gmra.mrb[10].mxu1 %vm1049_vm1, %v4590_v14  ;;  %vm1065_vm1 = vcmp.eq.s32.totalorder %v929_v45, %v5091_v44 }
 0x1f1   : > { %4225 = vmatprep.mubr.msk.f32.mxu1 %vm1050_vm3, %v4590_v14  ;;  %vm1066_vm3 = vcmp.eq.s32.totalorder %v5401_v40, %v5091_v44 }
 0x1f4   : > { %4226 = vmatmul.mubr.msk.f32.gmra.mrb[12].mxu1 %vm1051_vm4, %v4590_v14  ;;  %vm1067_vm4 = vcmp.eq.s32.totalorder %v935_v10, %v5091_v44 }
 0x1f5   : > { %4228 = vmatprep.mubr.msk.f32.mxu1 %vm1052_vm5, %v4590_v14  ;;  %vm1068_vm5 = vcmp.eq.s32.totalorder %v5408_v55, %v5091_v44  ;;  %v983_v55 = vpop.permute.xlu1 %982 }
 0x1f8   : > { %4229 = vmatmul.mubr.msk.f32.gmra.mrb[14].mxu1 %vm1053_vm6, %v4590_v14  ;;  %vm1069_vm6 = vcmp.eq.s32.totalorder %v941_v22, %v5091_v44 }
 0x1f9   : > { %4231 = vmatprep.mubr.msk.f32.mxu1 %vm1054_vm7, %v4590_v14  ;;  %vm1070_vm7 = vcmp.eq.s32.totalorder %v5419_v1, %v5091_v44  ;;  %v989_v40 = vpop.permute.xlu1 %988 }
 0x1fc   : > { %4232 = vmatmul.mubr.msk.f32.gmra.mrb[16].mxu1 %vm1055_vm8, %v4590_v14  ;;  %vm1071_vm8 = vcmp.eq.s32.totalorder %v947_v0, %v5091_v44 }
 0x1fd   : > { %4234 = vmatprep.mubr.msk.f32.mxu1 %vm1056_vm9, %v4590_v14  ;;  %vm1072_vm9 = vcmp.eq.s32.totalorder %v5431_v4, %v5091_v44  ;;  %v995_v1 = vpop.permute.xlu1 %994 }
 0x200   : > { %4235 = vmatmul.mubr.msk.f32.gmra.mrb[18].mxu1 %vm1057_vm10, %v4590_v14  ;;  %vm1073_vm10 = vcmp.eq.s32.totalorder %v953_v17, %v5091_v44  ;;  %v2614_v17 = vsub.s32 0, %v5577_v18 }
 0x201   : > { %4237 = vmatprep.mubr.msk.f32.mxu1 %vm1058_vm2, %v4590_v14  ;;  %vm1074_vm2 = vcmp.eq.s32.totalorder %v5445_v7, %v5091_v44  ;;  %v1001_v4 = vpop.permute.xlu1 %1000 }
 0x204   : > { %4238 = vmatmul.mubr.msk.f32.gmra.mrb[20].mxu1 %vm1059_vm11, %v4590_v14  ;;  %vm1075_vm11 = vcmp.eq.s32.totalorder %v959_v6, %v5091_v44 }
 0x205   : > { %4240 = vmatprep.mubr.msk.f32.mxu1 %vm1060_vm12, %v4590_v14  ;;  %vm1076_vm12 = vcmp.eq.s32.totalorder %v5459_v49, %v5091_v44  ;;  %v1007_v7 = vpop.permute.xlu1 %1006 }
 0x208   : > { %4241 = vmatmul.mubr.msk.f32.gmra.mrb[22].mxu1 %vm1061_vm13, %v4590_v14  ;;  %vm1077_vm13 = vcmp.eq.s32.totalorder %v965_v54, %v5091_v44 }
 0x209   : > { %4243 = vmatprep.mubr.msk.f32.mxu1 %vm1062_vm14, %v4590_v14  ;;  %vm1078_vm14 = vcmp.eq.s32.totalorder %v5471_v13, %v5091_v44  ;;  %v1013_v49 = vpop.permute.xlu1 %1012 }
 0x20c   : > { %4244 = vmatmul.mubr.msk.f32.gmra.mrb[24].mxu1 %vm1063_vm15, %v4590_v14  ;;  %vm1079_vm15 = vcmp.eq.s32.totalorder %v971_v5, %v5091_v44 }
 0x20d   : > { %4246 = vmatprep.mubr.msk.f32.mxu1 %vm1064_vm0, %v4590_v14  ;;  %vm1080_vm0 = vcmp.eq.s32.totalorder %v5485_v16, %v5091_v44  ;;  %v1019_v13 = vpop.permute.xlu1 %1018 }
 0x210   : > { %4247 = vmatmul.mubr.msk.f32.gmra.mrb[26].mxu1 %vm1065_vm1, %v4590_v14  ;;  %vm1081_vm1 = vcmp.eq.s32.totalorder %v977_v38, %v5091_v44  ;;  %v5929_v38 = vrot.slane %v5598_v52, %v2614_v17 }
 0x211   : > { %4249 = vmatprep.mubr.msk.f32.mxu1 %vm1066_vm3, %v4590_v14  ;;  %vm1082_vm3 = vcmp.eq.s32.totalorder %v5499_v8, %v5091_v44  ;;  %v1025_v16 = vpop.permute.xlu1 %1024 }
 0x214   : > { %4250 = vmatmul.mubr.msk.f32.gmra.mrb[28].mxu1 %vm1067_vm4, %v4590_v14  ;;  %vm1083_vm4 = vcmp.eq.s32.totalorder %v983_v55, %v5091_v44 }
 0x215   : > { %4252 = vmatprep.mubr.msk.f32.mxu1 %vm1068_vm5, %v4590_v14  ;;  %vm1084_vm5 = vcmp.eq.s32.totalorder %v5511_v25, %v5091_v44  ;;  %v1031_v8 = vpop.permute.xlu1 %1030 }
 0x218   : > { %4253 = vmatmul.mubr.msk.f32.gmra.mrb[30].mxu1 %vm1069_vm6, %v4590_v14  ;;  %vm1085_vm6 = vcmp.eq.s32.totalorder %v989_v40, %v5091_v44  ;;  %v5932_v40 = vadd.s32 8, %v5577_v18 }
 0x219   : > { %4255 = vmatprep.mubr.msk.f32.mxu1 %vm1070_vm7, %v4590_v14  ;;  %vm1086_vm7 = vcmp.eq.s32.totalorder %v5523_v28, %v5091_v44  ;;  %v1037_v25 = vpop.permute.xlu1 %1036 }
 0x21c   : > { %4256 = vmatmul.mubr.msk.f32.gmra.mrb[32].mxu1 %vm1071_vm8, %v4590_v14  ;;  %vm1087_vm8 = vcmp.eq.s32.totalorder %v995_v1, %v5091_v44 }
 0x21d   : > { %4258 = vmatprep.mubr.msk.f32.mxu1 %vm1072_vm9, %v4590_v14  ;;  %vm1088_vm9 = vcmp.eq.s32.totalorder %v5535_v32, %v5091_v44 }
 0x220   : > { %4259 = vmatmul.mubr.msk.f32.gmra.mrb[34].mxu1 %vm1073_vm10, %v4590_v14  ;;  %vm1089_vm10 = vcmp.eq.s32.totalorder %v1001_v4, %v5091_v44 }
 0x221   : > { %4261 = vmatprep.mubr.msk.f32.mxu1 %vm1074_vm2, %v4590_v14  ;;  %vm1090_vm2 = vcmp.eq.s32.totalorder %v5545_v36, %v5091_v44 }
 0x224   : > { %4262 = vmatmul.mubr.msk.f32.gmra.mrb[36].mxu1 %vm1075_vm11, %v4590_v14  ;;  %vm1091_vm11 = vcmp.eq.s32.totalorder %v1007_v7, %v5091_v44 }
 0x225   : > { %4264 = vmatprep.mubr.msk.f32.mxu1 %vm1076_vm12, %v4590_v14  ;;  %vm1092_vm12 = vcmp.eq.s32.totalorder %v5557_v39, %v5091_v44 }
 0x228   : > { %4265 = vmatmul.mubr.msk.f32.gmra.mrb[38].mxu1 %vm1077_vm13, %v4590_v14  ;;  %vm1093_vm13 = vcmp.eq.s32.totalorder %v1013_v49, %v5091_v44  ;;  %v5945_v49 = vadd.s32 16, %v5577_v18 }
 0x229   : > { %4267 = vmatprep.mubr.msk.f32.mxu1 %vm1078_vm14, %v4590_v14  ;;  %vm1094_vm14 = vcmp.eq.s32.totalorder %v5569_v43, %v5091_v44 }
 0x22c   : > { %4268 = vmatmul.mubr.msk.f32.gmra.mrb[40].mxu1 %vm1079_vm15, %v4590_v14  ;;  %vm1095_vm15 = vcmp.eq.s32.totalorder %v1019_v13, %v5091_v44  ;;  %v5947_v13 = vpop.permute.xlu1 %2715 }
 0x22d   : > { %4270 = vmatprep.mubr.msk.f32.mxu1 %vm1080_vm0, %v4590_v14  ;;  %vm1096_vm0 = vcmp.eq.s32.totalorder %v5582_v48, %v5091_v44 }
 0x230   : > { %4271 = vmatmul.mubr.msk.f32.gmra.mrb[42].mxu1 %vm1081_vm1, %v4590_v14  ;;  %vm1097_vm1 = vcmp.eq.s32.totalorder %v1025_v16, %v5091_v44 }
 0x231   : > { %4273 = vmatprep.mubr.msk.f32.mxu1 %vm1082_vm3, %v4590_v14  ;;  %vm1098_vm3 = vcmp.eq.s32.totalorder %v5600_v53, %v5091_v44 }
 0x234   : > { %4274 = vmatmul.mubr.msk.f32.gmra.mrb[44].mxu1 %vm1083_vm4, %v4590_v14  ;;  %vm1099_vm4 = vcmp.eq.s32.totalorder %v1031_v8, %v5091_v44 }
 0x235   : > { %4276 = vmatprep.mubr.msk.f32.mxu1 %vm1084_vm5, %v4590_v14  ;;  %vm1100_vm5 = vcmp.eq.s32.totalorder %v5615_v33, %v5091_v44 }
 0x238   : > { %4277 = vmatmul.mubr.msk.f32.gmra.mrb[46].mxu1 %vm1085_vm6, %v4590_v14  ;;  %vm1101_vm6 = vcmp.eq.s32.totalorder %v1037_v25, %v5091_v44 }
 0x239   : > { %4279 = vmatprep.mubr.msk.f32.mxu1 %vm1086_vm7, %v4590_v14  ;;  %vm2628_vm7 = vcmp.eq.s32.totalorder %v5929_v38, %v5577_v18 }
 0x23c   : > { %4280 = vmatmul.mubr.msk.f32.gmra.mrb[48].mxu1 %vm1087_vm8, %v4590_v14  ;;  %vm2633_vm8 = vcmp.eq.s32.totalorder %v5608_v57, %v5932_v40 }
 0x23d   : > { %4282 = vmatprep.mubr.msk.f32.mxu1 %vm1088_vm9, %v4590_v14  ;;  %vm2632_vm9 = vcmp.eq.s32.totalorder %v5929_v38, %v5932_v40 }
 0x240   : > { %4283 = vmatmul.mubr.msk.f32.gmra.mrb[50].mxu1 %vm1089_vm10, %v4590_v14  ;;  %vm2637_vm10 = vcmp.eq.s32.totalorder %v5608_v57, %v5945_v49 }
 0x241   : > { %4285 = vmatprep.mubr.msk.f32.mxu1 %vm1090_vm2, %v4590_v14  ;;  %vm2636_vm2 = vcmp.eq.s32.totalorder %v5929_v38, %v5945_v49 }
 0x244   : > { %4286 = vmatmul.mubr.msk.f32.gmra.mrb[52].mxu1 %vm1091_vm11, %v4590_v14 }
 0x245   : > { %4288 = vmatprep.mubr.msk.f32.mxu1 %vm1092_vm12, %v4590_v14 }
 0x248   : > { %4289 = vmatmul.mubr.msk.f32.gmra.mrb[54].mxu1 %vm1093_vm13, %v4590_v14 }
 0x249   : > { %4291 = vmatprep.mubr.msk.f32.mxu1 %vm1094_vm14, %v4590_v14 }
 0x24c   : > { %4292 = vmatmul.mubr.msk.f32.gmra.mrb[56].mxu1 %vm1095_vm15, %v4590_v14 }
 0x24d   : > { %4294 = vmatprep.mubr.msk.f32.mxu1 %vm1096_vm0, %v4590_v14 }
 0x250   : > { %4295 = vmatmul.mubr.msk.f32.gmra.mrb[58].mxu1 %vm1097_vm1, %v4590_v14 }
 0x251   : > { %4297 = vmatprep.mubr.msk.f32.mxu1 %vm1098_vm3, %v4590_v14 }
 0x254   : > { %4298 = vmatmul.mubr.msk.f32.gmra.mrb[60].mxu1 %vm1099_vm4, %v4590_v14 }
 0x255   : > { %4300 = vmatprep.mubr.msk.f32.mxu1 %vm1100_vm5, %v4590_v14 }
 0x258   : > { %4301 = vmatmul.mubr.msk.f32.gmra.mrb[62].mxu1 %vm1101_vm6, %v4590_v14 }
 0x2af   : > { %v4209_v28 = vpop.f32.mrb[0].mxu1 }
 0x2b0   : > { %v2276_v32 = vpop.f32.mrb[1].mxu1 }
 0x2b1   : > { %v4341_v36 = vpack.c.bf16 %v4209_v28, %v2276_v32  ;;  %v5962_v28 = vadd.s32 24, %v5577_v18  ;;  %v5964_v32 = vpop.permute.xlu0 %2720 }
 0x2b3   : > { %v4212_v39 = vpop.f32.mrb[2].mxu1  ;;  %vm2641_vm11 = vcmp.eq.s32.totalorder %v5608_v57, %v5962_v28  ;;  %vm2640_vm12 = vcmp.eq.s32.totalorder %v5929_v38, %v5962_v28 }
 0x2b4   : > { %v2286_v43 = vpop.f32.mrb[3].mxu1 }
 0x2b5   : > { %v4345_v48 = vpack.c.bf16 %v4212_v39, %v2286_v43 }
 0x2b7   : > { %v4215_v53 = vpop.f32.mrb[4].mxu1 }
 0x2b8   : > { %v2296_v20 = vpop.f32.mrb[5].mxu1 }
 0x2b9   : > { %v4349_v21 = vpack.c.bf16 %v4215_v53, %v2296_v20  ;;  %v5981_v53 = vpop.permute.xlu1 %2725 }
 0x2bb   : > { %v4218_v12 = vpop.f32.mrb[6].mxu1 }
 0x2bc   : > { %v2306_v27 = vpop.f32.mrb[7].mxu1 }
 0x2bd   : > { %v4353_v33 = vpack.c.bf16 %v4218_v12, %v2306_v27  ;;  %v5996_v27 = vadd.s32 40, %v5577_v18 }
 0x2bf   : > { %v4221_v56 = vpop.f32.mrb[8].mxu1  ;;  %vm2649_vm15 = vcmp.eq.s32.totalorder %v5608_v57, %v5996_v27  ;;  %vm2648_vm0 = vcmp.eq.s32.totalorder %v5929_v38, %v5996_v27 }
 0x2c0   : > { %v2316_v24 = vpop.f32.mrb[9].mxu1 }
 0x2c1   : > { %v4357_v42 = vpack.c.bf16 %v4221_v56, %v2316_v24 }
 0x2c3   : > { %v4224_v19 = vpop.f32.mrb[10].mxu1 }
 0x2c4   : > { %v2326_v34 = vpop.f32.mrb[11].mxu1 }
 0x2c5   : > { %v4361_v44 = vpack.c.bf16 %v4224_v19, %v2326_v34  ;;  %v6013_v19 = vadd.s32 48, %v5577_v18  ;;  %v6015_v34 = vpop.permute.xlu1 %2735 }
 0x2c7   : > { %v4227_v31 = vpop.f32.mrb[12].mxu1  ;;  %vm2653_vm1 = vcmp.eq.s32.totalorder %v5608_v57, %v6013_v19  ;;  %vm2652_vm3 = vcmp.eq.s32.totalorder %v5929_v38, %v6013_v19 }
 0x2c8   : > { %v2336_v41 = vpop.f32.mrb[13].mxu1 }
 0x2c9   : > { %v4365_v35 = vpack.c.bf16 %v4227_v31, %v2336_v41 }
 0x2cb   : > { %v4230_v29 = vpop.f32.mrb[14].mxu1 }
 0x2cc   : > { %v2346_v63 = vpop.f32.mrb[15].mxu1 }
 0x2cd   : > { %v4369_v23 = vpack.c.bf16 %v4230_v29, %v2346_v63 }
 0x2cf   : > { %v4233_v30 = vpop.f32.mrb[16].mxu1 }
 0x2d0   : > { %v2356_v62 = vpop.f32.mrb[17].mxu1 }
 0x2d1   : > { %v4339_v15 = vpack.c.bf16 %v4233_v30, %v2356_v62  ;;  %v6047_v62 = vadd.s32 64, %v5577_v18 }
 0x2d3   : > { %v4236_v14 = vpop.f32.mrb[18].mxu1  ;;  %4340 = vmatprep.subr.bf16.mxu0 %v4339_v15  ;;  %v6049_v15 = vpop.permute.xlu1 %2745  ;;  %vm2661_vm6 = vcmp.eq.s32.totalorder %v5608_v57, %v6047_v62 }
 0x2d4   : > { %v2366_v47 = vpop.f32.mrb[19].mxu1  ;;  %4342 = vmatpush3.bf16.msra.mxu0 %v4341_v36 }
 0x2d5   : > { %v4343_v37 = vpack.c.bf16 %v4236_v14, %v2366_v47 }
 0x2d7   : > { %v4239_v9 = vpop.f32.mrb[20].mxu1  ;;  %4344 = vmatprep.subr.bf16.mxu0 %v4343_v37 }
 0x2d8   : > { %v2376_v2 = vpop.f32.mrb[21].mxu1  ;;  %4346 = vmatpush3.bf16.msra.mxu0 %v4345_v48  ;;  %v5979_v48 = vadd.s32 32, %v5577_v18 }
 0x2d9   : > { %v4347_v60 = vpack.c.bf16 %v4239_v9, %v2376_v2  ;;  %v6064_v9 = vadd.s32 72, %v5577_v18 }
 0x2da   : > { %vm2645_vm13 = vcmp.eq.s32.totalorder %v5608_v57, %v5979_v48  ;;  %vm2644_vm14 = vcmp.eq.s32.totalorder %v5929_v38, %v5979_v48 }
 0x2db   : > { %v4242_v11 = vpop.f32.mrb[22].mxu1  ;;  %4348 = vmatprep.subr.bf16.mxu0 %v4347_v60 }
 0x2dc   : > { %v2386_v45 = vpop.f32.mrb[23].mxu1  ;;  %4350 = vmatpush3.bf16.msra.mxu0 %v4349_v21 }
 0x2dd   : > { %v4351_v3 = vpack.c.bf16 %v4242_v11, %v2386_v45 }
 0x2df   : > { %v4245_v10 = vpop.f32.mrb[24].mxu1  ;;  %4352 = vmatprep.subr.bf16.mxu0 %v4351_v3  ;;  %v6075_v3 = vadd.s32 80, %v5577_v18 }
 0x2e0   : > { %v2396_v26 = vpop.f32.mrb[25].mxu1  ;;  %4354 = vmatpush3.bf16.msra.mxu0 %v4353_v33  ;;  %v5998_v33 = vpop.permute.xlu0 %2730 }
 0x2e1   : > { %v4355_v51 = vpack.c.bf16 %v4245_v10, %v2396_v26  ;;  %v6077_v10 = vpop.permute.xlu1 %2755 }
 0x2e3   : > { %v4248_v22 = vpop.f32.mrb[26].mxu1  ;;  %4356 = vmatprep.subr.bf16.mxu0 %v4355_v51 }
 0x2e4   : > { %v2406_v46 = vpop.f32.mrb[27].mxu1  ;;  %4358 = vmatpush3.bf16.msra.mxu0 %v4357_v42  ;;  %v6032_v29 = vpop.permute.xlu0 %2740 }
 0x2e5   : > { %v4359_v0 = vpack.c.bf16 %v4248_v22, %v2406_v46  ;;  %v6089_v46 = vadd.s32 88, %v5577_v18 }
 0x2e7   : > { %v4251_v59 = vpop.f32.mrb[28].mxu1  ;;  %4360 = vmatprep.subr.bf16.mxu0 %v4359_v0 }
 0x2e8   : > { %v2416_v50 = vpop.f32.mrb[29].mxu1  ;;  %4362 = vmatpush3.bf16.msra.mxu0 %v4361_v44  ;;  %v6066_v2 = vpop.permute.xlu0 %2750 }
 0x2e9   : > { %v4363_v6 = vpack.c.bf16 %v4251_v59, %v2416_v50 }
 0x2eb   : > { %v4254_v54 = vpop.f32.mrb[30].mxu1  ;;  %4364 = vmatprep.subr.bf16.mxu0 %v4363_v6  ;;  %v6103_v6 = vadd.s32 96, %v5577_v18 }
 0x2ec   : > { %v2426_v5 = vpop.f32.mrb[31].mxu1  ;;  %4366 = vmatpush3.bf16.msra.mxu0 %v4365_v35  ;;  %v6030_v35 = vadd.s32 56, %v5577_v18  ;;  %v6091_v0 = vpop.permute.xlu0 %2760 }
 0x2ed   : > { %v4367_v55 = vpack.c.bf16 %v4254_v54, %v2426_v5  ;;  %v6105_v54 = vpop.permute.xlu1 %2765 }
 0x2ee   : > { %vm2657_vm4 = vcmp.eq.s32.totalorder %v5608_v57, %v6030_v35  ;;  %vm2656_vm5 = vcmp.eq.s32.totalorder %v5929_v38, %v6030_v35 }
 0x2ef   : > { %v5934_v1 = vpop.f32.mrb[32].mxu1  ;;  %4368 = vmatprep.subr.bf16.mxu0 %v4367_v55 }
 0x2f0   : > { %v5936_v4 = vpop.f32.mrb[33].mxu1  ;;  %4370 = vmatpush3.bf16.msra.mxu0 %v4369_v23 }
 0x2f1   : > { %v4373_v7 = vpack.c.bf16 %v5934_v1, %v5936_v4  ;;  %v6117_v4 = vadd.s32 104, %v5577_v18 }
 0x2f3   : > { %v5949_v16 = vpop.f32.mrb[34].mxu1  ;;  %3670 = vmatmul.mubr.msk.f32.vlgmr.msra.gmra.mrb[36].mxu0 %vm2628_vm7, %v5627_v61  ;;  %vm2660_vm7 = vcmp.eq.s32.totalorder %v5929_v38, %v6047_v62 }
 0x2f4   : > { %v5952_v8 = vpop.f32.mrb[35].mxu1  ;;  %3671 = vmatprep.mubr.msk.f32.mxu0 %vm2633_vm8, %v5947_v13  ;;  %vm2665_vm8 = vcmp.eq.s32.totalorder %v5608_v57, %v6064_v9 }
 0x2f5   : > { %v4377_v25 = vpack.c.bf16 %v5949_v16, %v5952_v8 }
 0x2f7   : > { %v5966_v36 = vpop.f32.mrb[36].mxu1  ;;  %3672 = vmatmul.mubr.msk.f32.gmra.mrb[38].mxu0 %vm2632_vm9, %v5947_v13  ;;  %vm2664_vm9 = vcmp.eq.s32.totalorder %v5929_v38, %v6064_v9 }
 0x2f8   : > { %v5969_v39 = vpop.f32.mrb[37].mxu1  ;;  %3673 = vmatprep.mubr.msk.f32.mxu0 %vm2637_vm10, %v5964_v32  ;;  %vm2669_vm10 = vcmp.eq.s32.totalorder %v5608_v57, %v6075_v3 }
 0x2f9   : > { %v4381_v43 = vpack.c.bf16 %v5966_v36, %v5969_v39  ;;  %v6131_v36 = vadd.s32 112, %v5577_v18  ;;  %v6133_v39 = vpop.permute.xlu1 %2775 }
 0x2fb   : > { %v5983_v20 = vpop.f32.mrb[38].mxu1  ;;  %3674 = vmatmul.mubr.msk.f32.gmra.mrb[40].mxu0 %vm2636_vm2, %v5964_v32  ;;  %vm2668_vm2 = vcmp.eq.s32.totalorder %v5929_v38, %v6075_v3 }
 0x2fc   : > { %v5986_v21 = vpop.f32.mrb[39].mxu1  ;;  %3675 = vmatprep.mubr.msk.f32.mxu0 %vm2641_vm11, %v5981_v53  ;;  %vm2673_vm11 = vcmp.eq.s32.totalorder %v5608_v57, %v6089_v46 }
 0x2fd   : > { %v4385_v12 = vpack.c.bf16 %v5983_v20, %v5986_v21  ;;  %v6145_v21 = vadd.s32 120, %v5577_v18 }
 0x2ff   : > { %v6000_v56 = vpop.f32.mrb[40].mxu1  ;;  %3676 = vmatmul.mubr.msk.f32.gmra.mrb[42].mxu0 %vm2640_vm12, %v5981_v53  ;;  %vm2672_vm12 = vcmp.eq.s32.totalorder %v5929_v38, %v6089_v46 }
 0x300   : > { %v6003_v24 = vpop.f32.mrb[41].mxu1  ;;  %3677 = vmatprep.mubr.msk.f32.mxu0 %vm2645_vm13, %v5998_v33  ;;  %vm2677_vm13 = vcmp.eq.s32.totalorder %v5608_v57, %v6103_v6 }
 0x301   : > { %v4389_v42 = vpack.c.bf16 %v6000_v56, %v6003_v24  ;;  %v2622_v24 = vsub.s32 2, %v5577_v18 }
 0x303   : > { %v6017_v44 = vpop.f32.mrb[42].mxu1  ;;  %3678 = vmatmul.mubr.msk.f32.gmra.mrb[44].mxu0 %vm2644_vm14, %v5998_v33  ;;  %vm2676_vm14 = vcmp.eq.s32.totalorder %v5929_v38, %v6103_v6 }
 0x304   : > { %v6020_v31 = vpop.f32.mrb[43].mxu1  ;;  %3679 = vmatprep.mubr.msk.f32.mxu0 %vm2649_vm15, %v6015_v34  ;;  %vm2681_vm15 = vcmp.eq.s32.totalorder %v5608_v57, %v6117_v4 }
 0x305   : > { %v4393_v41 = vpack.c.bf16 %v6017_v44, %v6020_v31 }
 0x307   : > { %v6034_v63 = vpop.f32.mrb[44].mxu1  ;;  %3680 = vmatmul.mubr.msk.f32.gmra.mrb[46].mxu0 %vm2648_vm0, %v6015_v34  ;;  %vm2680_vm0 = vcmp.eq.s32.totalorder %v5929_v38, %v6117_v4 }
 0x308   : > { %v6037_v23 = vpop.f32.mrb[45].mxu1  ;;  %3681 = vmatprep.mubr.msk.f32.mxu0 %vm2653_vm1, %v6032_v29  ;;  %vm2685_vm1 = vcmp.eq.s32.totalorder %v5608_v57, %v6131_v36 }
 0x309   : > { %v4397_v30 = vpack.c.bf16 %v6034_v63, %v6037_v23 }
 0x30b   : > { %v6051_v14 = vpop.f32.mrb[46].mxu1  ;;  %3682 = vmatmul.mubr.msk.f32.gmra.mrb[48].mxu0 %vm2652_vm3, %v6032_v29  ;;  %vm2684_vm3 = vcmp.eq.s32.totalorder %v5929_v38, %v6131_v36 }
 0x30c   : > { %v6054_v47 = vpop.f32.mrb[47].mxu1  ;;  %3683 = vmatprep.mubr.msk.f32.mxu0 %vm2657_vm4, %v6049_v15  ;;  %vm2689_vm4 = vcmp.eq.s32.totalorder %v5608_v57, %v6145_v21  ;;  %v6173_v57 = vrot.slane %v5598_v52, %v2622_v24 }
 0x30d   : > { %v4401_v37 = vpack.c.bf16 %v6051_v14, %v6054_v47 }
 0x30f   : > { %v4281_v60 = vpop.f32.mrb[48].mxu1  ;;  %3684 = vmatmul.mubr.msk.f32.gmra.mrb[50].mxu0 %vm2656_vm5, %v6049_v15  ;;  %vm2688_vm5 = vcmp.eq.s32.totalorder %v5929_v38, %v6145_v21 }
 0x310   : > { %v2516_v11 = vpop.f32.mrb[49].mxu1  ;;  %3685 = vmatprep.mubr.msk.f32.mxu0 %vm2661_vm6, %v6066_v2 }
 0x311   : > { %v4371_v45 = vpack.c.bf16 %v4281_v60, %v2516_v11 }
 0x313   : > { %v4284_v26 = vpop.f32.mrb[50].mxu1  ;;  %3686 = vmatmul.mubr.msk.f32.gmra.mrb[52].mxu0 %vm2660_vm7, %v6066_v2  ;;  %4372 = vmatprep.subr.bf16.mxu0 %v4371_v45  ;;  %vm2630_vm7 = vcmp.eq.s32.totalorder %v6173_v57, %v5577_v18 }
 0x314   : > { %v2526_v51 = vpop.f32.mrb[51].mxu1  ;;  %3687 = vmatprep.mubr.msk.f32.mxu0 %vm2665_vm8, %v6077_v10  ;;  %4374 = vmatpush3.bf16.msra.mxu0 %v4373_v7  ;;  %v6119_v7 = vpop.permute.xlu0 %2770 }
 0x315   : > { %v4375_v22 = vpack.c.bf16 %v4284_v26, %v2526_v51  ;;  %v6163_v51 = vpop.permute.xlu1 %2785 }
 0x317   : > { %v4287_v59 = vpop.f32.mrb[52].mxu1  ;;  %3688 = vmatmul.mubr.msk.f32.gmra.mrb[54].mxu0 %vm2664_vm9, %v6077_v10  ;;  %4376 = vmatprep.subr.bf16.mxu0 %v4375_v22  ;;  %vm2634_vm9 = vcmp.eq.s32.totalorder %v6173_v57, %v5932_v40 }
 0x318   : > { %v2536_v50 = vpop.f32.mrb[53].mxu1  ;;  %3689 = vmatprep.mubr.msk.f32.mxu0 %vm2669_vm10, %v6091_v0  ;;  %4378 = vmatpush3.bf16.msra.mxu0 %v4377_v25  ;;  %v6148_v11 = vpop.permute.xlu0 %2780 }
 0x319   : > { %v4379_v17 = vpack.c.bf16 %v4287_v59, %v2536_v50 }
 0x31b   : > { %v4290_v5 = vpop.f32.mrb[54].mxu1  ;;  %3690 = vmatmul.mubr.msk.f32.gmra.mrb[56].mxu0 %vm2668_vm2, %v6091_v0  ;;  %4380 = vmatprep.subr.bf16.mxu0 %v4379_v17  ;;  %vm2638_vm2 = vcmp.eq.s32.totalorder %v6173_v57, %v5945_v49 }
 0x31c   : > { %v2546_v55 = vpop.f32.mrb[55].mxu1  ;;  %3691 = vmatprep.mubr.msk.f32.mxu0 %vm2673_vm11, %v6105_v54  ;;  %4382 = vmatpush3.bf16.msra.mxu0 %v4381_v43 }
 0x31d   : > { %v4383_v1 = vpack.c.bf16 %v4290_v5, %v2546_v55 }
 0x31f   : > { %v4293_v16 = vpop.f32.mrb[56].mxu1  ;;  %3692 = vmatmul.mubr.msk.f32.gmra.mrb[58].mxu0 %vm2672_vm12, %v6105_v54  ;;  %4384 = vmatprep.subr.bf16.mxu0 %v4383_v1  ;;  %vm2642_vm12 = vcmp.eq.s32.totalorder %v6173_v57, %v5962_v28 }
 0x320   : > { %v2556_v8 = vpop.f32.mrb[57].mxu1  ;;  %3693 = vmatprep.mubr.msk.f32.mxu0 %vm2677_vm13, %v6119_v7  ;;  %4386 = vmatpush3.bf16.msra.mxu0 %v4385_v12  ;;  %v2626_v12 = vsub.s32 3, %v5577_v18 }
 0x321   : > { %v4387_v25 = vpack.c.bf16 %v4293_v16, %v2556_v8 }
 0x322   : > { %v6161_v26 = vrot.slane %v5598_v52, %v2626_v12 }
 0x323   : > { %v4296_v43 = vpop.f32.mrb[58].mxu1  ;;  %3694 = vmatmul.mubr.msk.f32.gmra.mrb[60].mxu0 %vm2676_vm14, %v6119_v7  ;;  %4388 = vmatprep.subr.bf16.mxu0 %v4387_v25  ;;  %vm2646_vm14 = vcmp.eq.s32.totalorder %v6173_v57, %v5979_v48 }
 0x324   : > { %v2566_v60 = vpop.f32.mrb[59].mxu1  ;;  %3695 = vmatprep.mubr.msk.f32.mxu0 %vm2681_vm15, %v6133_v39  ;;  %4390 = vmatpush3.bf16.msra.mxu0 %v4389_v42  ;;  %vm2631_vm6 = vcmp.eq.s32.totalorder %v6161_v26, %v5577_v18  ;;  %vm2635_vm8 = vcmp.eq.s32.totalorder %v6161_v26, %v5932_v40  ;;  %vm2639_vm10 = vcmp.eq.s32.totalorder %v6161_v26, %v5945_v49 }
 0x325   : > { %v4391_v20 = vpack.c.bf16 %v4296_v43, %v2566_v60  ;;  %vm2643_vm11 = vcmp.eq.s32.totalorder %v6161_v26, %v5962_v28  ;;  %vm2647_vm13 = vcmp.eq.s32.totalorder %v6161_v26, %v5979_v48  ;;  %vm2651_vm15 = vcmp.eq.s32.totalorder %v6161_v26, %v5996_v27 }
 0x327   : > { %v4299_v45 = vpop.f32.mrb[60].mxu1  ;;  %3696 = vmatmul.mubr.msk.f32.gmra.mrb[62].mxu0 %vm2680_vm0, %v6133_v39  ;;  %4392 = vmatprep.subr.bf16.mxu0 %v4391_v20  ;;  %vm2650_vm0 = vcmp.eq.s32.totalorder %v6173_v57, %v5996_v27 }
 0x328   : > { %v2576_v56 = vpop.f32.mrb[61].mxu1  ;;  %3697 = vmatprep.mubr.msk.f32.mxu0 %vm2685_vm1, %v6148_v11  ;;  %4394 = vmatpush3.bf16.msra.mxu0 %v4393_v41  ;;  %vm2655_vm1 = vcmp.eq.s32.totalorder %v6161_v26, %v6013_v19 }
 0x329   : > { %v4395_v42 = vpack.c.bf16 %v4299_v45, %v2576_v56  ;;  %v6441_v56 = vld [vmem:[#allocation19_spill] sm:$0xff] }
 0x32b   : > { %v4302_v22 = vpop.f32.mrb[62].mxu1  ;;  %3698 = vmatmul.mubr.msk.f32.gmra.mrb[64].mxu0 %vm2684_vm3, %v6148_v11  ;;  %4396 = vmatprep.subr.bf16.mxu0 %v4395_v42  ;;  %vm2654_vm3 = vcmp.eq.s32.totalorder %v6173_v57, %v6013_v19 }
 0x32c   : > { %v2586_v44 = vpop.f32.mrb[63].mxu1  ;;  %3699 = vmatprep.mubr.msk.f32.mxu0 %vm2689_vm4, %v6163_v51  ;;  %4398 = vmatpush3.bf16.msra.mxu0 %v4397_v30  ;;  %vm2659_vm4 = vcmp.eq.s32.totalorder %v6161_v26, %v6030_v35 }
 0x32d   : > { %v4399_v31 = vpack.c.bf16 %v4302_v22, %v2586_v44 }
 0x32f   : > { %3700 = vmatmul.mubr.msk.f32.gmra.mrb[66].mxu0 %vm2688_vm5, %v6163_v51  ;;  %4400 = vmatprep.subr.bf16.mxu0 %v4399_v31  ;;  %vm2658_vm5 = vcmp.eq.s32.totalorder %v6173_v57, %v6030_v35  ;;  %v6442_v31 = vld [vmem:[#allocation21_spill] sm:$0xff] }
 0x330   : > { %4402 = vmatpush3.bf16.msra.mxu0 %v4401_v37  ;;  %3701 = vmatprep.mubr.msk.f32.mxu0 %vm2631_vm6, %v5627_v61  ;;  %vm2663_vm6 = vcmp.eq.s32.totalorder %v6161_v26, %v6047_v62 }
 0x333   : > { %3702 = vmatmul.mubr.msk.f32.vlgmr.msra.gmra.mrb[68].mxu0 %vm2630_vm7, %v5627_v61  ;;  %vm2662_vm7 = vcmp.eq.s32.totalorder %v6173_v57, %v6047_v62 }
 0x334   : > { %3703 = vmatprep.mubr.msk.f32.mxu0 %vm2635_vm8, %v5947_v13  ;;  %vm2667_vm8 = vcmp.eq.s32.totalorder %v6161_v26, %v6064_v9 }
 0x337   : > { %3704 = vmatmul.mubr.msk.f32.gmra.mrb[70].mxu0 %vm2634_vm9, %v5947_v13  ;;  %vm2666_vm9 = vcmp.eq.s32.totalorder %v6173_v57, %v6064_v9 }
 0x338   : > { %3705 = vmatprep.mubr.msk.f32.mxu0 %vm2639_vm10, %v5964_v32  ;;  %vm2671_vm10 = vcmp.eq.s32.totalorder %v6161_v26, %v6075_v3 }
 0x33b   : > { %3706 = vmatmul.mubr.msk.f32.gmra.mrb[72].mxu0 %vm2638_vm2, %v5964_v32  ;;  %vm2670_vm2 = vcmp.eq.s32.totalorder %v6173_v57, %v6075_v3 }
 0x33c   : > { %3707 = vmatprep.mubr.msk.f32.mxu0 %vm2643_vm11, %v5981_v53  ;;  %vm2675_vm11 = vcmp.eq.s32.totalorder %v6161_v26, %v6089_v46 }
 0x33f   : > { %3708 = vmatmul.mubr.msk.f32.gmra.mrb[74].mxu0 %vm2642_vm12, %v5981_v53  ;;  %vm2674_vm12 = vcmp.eq.s32.totalorder %v6173_v57, %v6089_v46 }
 0x340   : > { %3709 = vmatprep.mubr.msk.f32.mxu0 %vm2647_vm13, %v5998_v33  ;;  %vm2679_vm13 = vcmp.eq.s32.totalorder %v6161_v26, %v6103_v6 }
 0x343   : > { %3710 = vmatmul.mubr.msk.f32.gmra.mrb[76].mxu0 %vm2646_vm14, %v5998_v33  ;;  %vm2678_vm14 = vcmp.eq.s32.totalorder %v6173_v57, %v6103_v6 }
 0x344   : > { %3711 = vmatprep.mubr.msk.f32.mxu0 %vm2651_vm15, %v6015_v34  ;;  %vm2683_vm15 = vcmp.eq.s32.totalorder %v6161_v26, %v6117_v4 }
 0x347   : > { %3712 = vmatmul.mubr.msk.f32.gmra.mrb[78].mxu0 %vm2650_vm0, %v6015_v34  ;;  %vm2682_vm0 = vcmp.eq.s32.totalorder %v6173_v57, %v6117_v4 }
 0x348   : > { %3713 = vmatprep.mubr.msk.f32.mxu0 %vm2655_vm1, %v6032_v29  ;;  %vm2687_vm1 = vcmp.eq.s32.totalorder %v6161_v26, %v6131_v36 }
 0x34b   : > { %3714 = vmatmul.mubr.msk.f32.gmra.mrb[80].mxu0 %vm2654_vm3, %v6032_v29  ;;  %vm2686_vm3 = vcmp.eq.s32.totalorder %v6173_v57, %v6131_v36 }
 0x34c   : > { %3715 = vmatprep.mubr.msk.f32.mxu0 %vm2659_vm4, %v6049_v15  ;;  %vm2691_vm4 = vcmp.eq.s32.totalorder %v6161_v26, %v6145_v21 }
 0x34f   : > { %3716 = vmatmul.mubr.msk.f32.gmra.mrb[82].mxu0 %vm2658_vm5, %v6049_v15  ;;  %vm2690_vm5 = vcmp.eq.s32.totalorder %v6173_v57, %v6145_v21 }
 0x350   : > { %3717 = vmatprep.mubr.msk.f32.mxu0 %vm2663_vm6, %v6066_v2 }
 0x353   : > { %3718 = vmatmul.mubr.msk.f32.gmra.mrb[84].mxu0 %vm2662_vm7, %v6066_v2 }
 0x354   : > { %3719 = vmatprep.mubr.msk.f32.mxu0 %vm2667_vm8, %v6077_v10 }
 0x357   : > { %3720 = vmatmul.mubr.msk.f32.gmra.mrb[86].mxu0 %vm2666_vm9, %v6077_v10 }
 0x358   : > { %3721 = vmatprep.mubr.msk.f32.mxu0 %vm2671_vm10, %v6091_v0 }
 0x35b   : > { %3722 = vmatmul.mubr.msk.f32.gmra.mrb[88].mxu0 %vm2670_vm2, %v6091_v0 }
 0x35c   : > { %3723 = vmatprep.mubr.msk.f32.mxu0 %vm2675_vm11, %v6105_v54 }
 0x35f   : > { %3724 = vmatmul.mubr.msk.f32.gmra.mrb[90].mxu0 %vm2674_vm12, %v6105_v54 }
 0x360   : > { %3725 = vmatprep.mubr.msk.f32.mxu0 %vm2679_vm13, %v6119_v7 }
 0x363   : > { %3726 = vmatmul.mubr.msk.f32.gmra.mrb[92].mxu0 %vm2678_vm14, %v6119_v7 }
 0x364   : > { %3727 = vmatprep.mubr.msk.f32.mxu0 %vm2683_vm15, %v6133_v39 }
 0x367   : > { %3728 = vmatmul.mubr.msk.f32.gmra.mrb[94].mxu0 %vm2682_vm0, %v6133_v39 }
 0x368   : > { %3729 = vmatprep.mubr.msk.f32.mxu0 %vm2687_vm1, %v6148_v11 }
 0x36b   : > { %3730 = vmatmul.mubr.msk.f32.gmra.mrb[96].mxu0 %vm2686_vm3, %v6148_v11 }
 0x36c   : > { %3731 = vmatprep.mubr.msk.f32.mxu0 %vm2691_vm4, %v6163_v51 }
 0x36f   : > { %3732 = vmatmul.mubr.msk.f32.gmra.mrb[98].mxu0 %vm2690_vm5, %v6163_v51 }
 0x3c6   : > { %v3927_v18 = vpop.f32.mrb[36].mxu0 }
 0x3c7   : > { %v3928_v52 = vpop.f32.mrb[37].mxu0 }
 0x3c8   : > { %v3929_v61 = vadd.f32 %v3928_v52, %v3927_v18 }
 0x3ca   : > { %v3930_v38 = vpop.f32.mrb[38].mxu0 }
 0x3cb   : > { %v3931_v40 = vpop.f32.mrb[39].mxu0 }
 0x3cc   : > { %v3932_v49 = vadd.f32 %v3931_v40, %v3930_v38 }
 0x3ce   : > { %v3933_v13 = vpop.f32.mrb[40].mxu0 }
 0x3cf   : > { %v3934_v28 = vpop.f32.mrb[41].mxu0 }
 0x3d0   : > { %v3935_v32 = vadd.f32 %v3934_v28, %v3933_v13 }
 0x3d2   : > { %v3936_v48 = vpop.f32.mrb[42].mxu0 }
 0x3d3   : > { %v3937_v53 = vpop.f32.mrb[43].mxu0 }
 0x3d4   : > { %v6275_v27 = vadd.f32 %v3937_v53, %v3936_v48  ;;  %v6443_v48 = vld [vmem:[#allocation23_spill] sm:$0xff] }
 0x3d6   : > { %v3939_v33 = vpop.f32.mrb[44].mxu0 }
 0x3d7   : > { %v3940_v19 = vpop.f32.mrb[45].mxu0 }
 0x3d8   : > { %v6277_v34 = vadd.f32 %v3940_v19, %v3939_v33 }
 0x3da   : > { %v3942_v41 = vpop.f32.mrb[46].mxu0 }
 0x3db   : > { %v3943_v35 = vpop.f32.mrb[47].mxu0 }
 0x3dc   : > { %v6279_v29 = vadd.f32 %v3943_v35, %v3942_v41 }
 0x3de   : > { %v3945_v63 = vpop.f32.mrb[48].mxu0 }
 0x3df   : > { %v3946_v23 = vpop.f32.mrb[49].mxu0 }
 0x3e0   : > { %v6281_v30 = vadd.f32 %v3946_v23, %v3945_v63  ;;  %v6444_v23 = vld [vmem:[#allocation25_spill] sm:$0xff] }
 0x3e2   : > { %v3948_v62 = vpop.f32.mrb[50].mxu0 }
 0x3e3   : > { %v3949_v15 = vpop.f32.mrb[51].mxu0 }
 0x3e4   : > { %v6283_v14 = vadd.f32 %v3949_v15, %v3948_v62 }
 0x3e6   : > { %v3951_v47 = vpop.f32.mrb[52].mxu0 }
 0x3e7   : > { %v3952_v37 = vpop.f32.mrb[53].mxu0 }
 0x3e8   : > { %v6285_v9 = vadd.f32 %v3952_v37, %v3951_v47 }
 0x3ea   : > { %v3954_v2 = vpop.f32.mrb[54].mxu0 }
 0x3eb   : > { %v3955_v3 = vpop.f32.mrb[55].mxu0 }
 0x3ec   : > { %v6287_v10 = vadd.f32 %v3955_v3, %v3954_v2 }
 0x3ee   : > { %v3957_v46 = vpop.f32.mrb[56].mxu0 }
 0x3ef   : > { %v3958_v0 = vpop.f32.mrb[57].mxu0 }
 0x3f0   : > { %v6289_v59 = vadd.f32 %v3958_v0, %v3957_v46  ;;  %v6445_v46 = vld [vmem:[#allocation27_spill] sm:$0xff] }
 0x3f2   : > { %v3960_v50 = vpop.f32.mrb[58].mxu0 }
 0x3f3   : > { %v3961_v17 = vpop.f32.mrb[59].mxu0 }
 0x3f4   : > { %v6291_v6 = vadd.f32 %v3961_v17, %v3960_v50 }
 0x3f6   : > { %v3963_v54 = vpop.f32.mrb[60].mxu0 }
 0x3f7   : > { %v3964_v5 = vpop.f32.mrb[61].mxu0 }
 0x3f8   : > { %v6293_v55 = vadd.f32 %v3964_v5, %v3963_v54 }
 0x3fa   : > { %v3966_v1 = vpop.f32.mrb[62].mxu0 }
 0x3fb   : > { %v3967_v4 = vpop.f32.mrb[63].mxu0 }
 0x3fc   : > { %v6295_v7 = vadd.f32 %v3967_v4, %v3966_v1  ;;  %v6446_v4 = vld [vmem:[#allocation29_spill] sm:$0xff] }
 0x3fe   : > { %v3969_v16 = vpop.f32.mrb[64].mxu0 }
 0x3ff   : > { %v3970_v8 = vpop.f32.mrb[65].mxu0 }
 0x400   : > { %v6297_v25 = vadd.f32 %v3970_v8, %v3969_v16 }
 0x402   : > { %v3972_v36 = vpop.f32.mrb[66].mxu0 }
 0x403   : > { %v3973_v39 = vpop.f32.mrb[67].mxu0 }
 0x404   : > { %v6299_v43 = vadd.f32 %v3973_v39, %v3972_v36 }
 0x406   : > { %v4007_v60 = vpop.f32.mrb[68].mxu0 }
 0x407   : > { %v4008_v20 = vpop.f32.mrb[69].mxu0 }
 0x408   : > { %v4009_v21 = vadd.f32 %v4008_v20, %v4007_v60 }
 0x40a   : > { %v3080_v12 = vadd.f32 %v4009_v21, %v3929_v61  ;;  %v4010_v11 = vpop.f32.mrb[70].mxu0  ;;  %v6447_v21 = vld [vmem:[#allocation31_spill] sm:$0xff] }
 0x40b   : > { %v4011_v45 = vpop.f32.mrb[71].mxu0 }
 0x40c   : > { %v3158_v24 = vadd.f32 %v3080_v12, %v6441_v56  ;;  %v4012_v42 = vadd.f32 %v4011_v45, %v4010_v11 }
 0x40e   : > { %vm3209_vm6 = vcmp.ge.f32.partialorder %v3158_v24, 0.0  ;;  %v3225_v26 = vmul.f32 0.22916667, %v3158_v24  ;;  %v3085_v51 = vadd.f32 %v4012_v42, %v3932_v49  ;;  %v4013_v22 = vpop.f32.mrb[72].mxu0 }
 0x40f   : > { %v4014_v44 = vpop.f32.mrb[73].mxu0 }
 0x410   : > { %v3241_v57 = vsel %vm3209_vm6, %v3158_v24, %v3225_v26  ;;  %v3159_v18 = vadd.f32 %v3085_v51, %v6442_v31  ;;  %v4015_v52 = vadd.f32 %v4014_v44, %v4013_v22  ;;  %v6448_v26 = vld [vmem:[#allocation33_spill] sm:$0xff] }
 0x411   : > { %3257 = vst [vmem:[#allocation6] sm:$0xff] %v3241_v57 }
 0x412   : > { %vm3210_vm7 = vcmp.ge.f32.partialorder %v3159_v18, 0.0  ;;  %v3226_v38 = vmul.f32 0.22916667, %v3159_v18  ;;  %v3090_v40 = vadd.f32 %v4015_v52, %v3935_v32  ;;  %v4016_v13 = vpop.f32.mrb[74].mxu0  ;;  %v6449_v52 = vld [vmem:[#allocation35_spill] sm:$0xff] }
 0x413   : > { %v4017_v61 = vpop.f32.mrb[75].mxu0 }
 0x414   : > { %v3242_v28 = vsel %vm3210_vm7, %v3159_v18, %v3226_v38  ;;  %v3160_v53 = vadd.f32 %v3090_v40, %v6443_v48  ;;  %v4018_v33 = vadd.f32 %v4017_v61, %v4016_v13 }
 0x415   : > { %3258 = vst [vmem:[#allocation6 + $0x8] sm:$0xff] %v3242_v28 }
 0x416   : > { %vm3211_vm8 = vcmp.ge.f32.partialorder %v3160_v53, 0.0  ;;  %v3227_v19 = vmul.f32 0.22916667, %v3160_v53  ;;  %v3095_v49 = vadd.f32 %v4018_v33, %v6275_v27  ;;  %v4019_v41 = vpop.f32.mrb[76].mxu0 }
 0x417   : > { %v4020_v35 = vpop.f32.mrb[77].mxu0 }
 0x418   : > { %v3243_v63 = vsel %vm3211_vm8, %v3160_v53, %v3227_v19  ;;  %v3161_v62 = vadd.f32 %v3095_v49, %v6444_v23  ;;  %v4021_v15 = vadd.f32 %v4020_v35, %v4019_v41  ;;  %v6450_v53 = vld [vmem:[#allocation38_spill] sm:$0xff]  ;;  %v6451_v23 = vld [vmem:[#allocation41_spill] sm:$0xff] }
 0x419   : > { %3259 = vst [vmem:[#allocation6 + $0x10] sm:$0xff] %v3243_v63 }
 0x41a   : > { %vm3212_vm9 = vcmp.ge.f32.partialorder %v3161_v62, 0.0  ;;  %v3228_v32 = vmul.f32 0.22916667, %v3161_v62  ;;  %v3100_v47 = vadd.f32 %v4021_v15, %v6277_v34  ;;  %v4022_v37 = vpop.f32.mrb[78].mxu0 }
 0x41b   : > { %v4023_v2 = vpop.f32.mrb[79].mxu0 }
 0x41c   : > { %v3244_v3 = vsel %vm3212_vm9, %v3161_v62, %v3228_v32  ;;  %v3162_v0 = vadd.f32 %v3100_v47, %v6445_v46  ;;  %v4024_v50 = vadd.f32 %v4023_v2, %v4022_v37 }
 0x41d   : > { %3260 = vst [vmem:[#allocation6 + $0x18] sm:$0xff] %v3244_v3  ;;  %v6452_v3 = vld [vmem:[#allocation43_spill] sm:$0xff] }
 0x41e   : > { %vm3213_vm10 = vcmp.ge.f32.partialorder %v3162_v0, 0.0  ;;  %v3229_v27 = vmul.f32 0.22916667, %v3162_v0  ;;  %v3105_v17 = vadd.f32 %v4024_v50, %v6279_v29  ;;  %v4025_v54 = vpop.f32.mrb[80].mxu0 }
 0x41f   : > { %v4026_v5 = vpop.f32.mrb[81].mxu0 }
 0x420   : > { %v3245_v1 = vsel %vm3213_vm10, %v3162_v0, %v3229_v27  ;;  %v3163_v16 = vadd.f32 %v3105_v17, %v6446_v4  ;;  %v4027_v8 = vadd.f32 %v4026_v5, %v4025_v54  ;;  %v6453_v5 = vld [vmem:[#allocation45_spill] sm:$0xff] }
 0x421   : > { %3261 = vst [vmem:[#allocation6 + $0x20] sm:$0xff] %v3245_v1 }
 0x422   : > { %vm3214_vm2 = vcmp.ge.f32.partialorder %v3163_v16, 0.0  ;;  %v3230_v34 = vmul.f32 0.22916667, %v3163_v16  ;;  %v3110_v36 = vadd.f32 %v4027_v8, %v6281_v30  ;;  %v4028_v39 = vpop.f32.mrb[82].mxu0 }
 0x423   : > { %v4029_v60 = vpop.f32.mrb[83].mxu0 }
 0x424   : > { %v3246_v20 = vsel %vm3214_vm2, %v3163_v16, %v3230_v34  ;;  %v3164_v12 = vadd.f32 %v3110_v36, %v6447_v21  ;;  %v4030_v11 = vadd.f32 %v4029_v60, %v4028_v39  ;;  %v6454_v39 = vld [vmem:[#allocation47_spill] sm:$0xff] }
 0x425   : > { %3262 = vst [vmem:[#allocation6 + $0x28] sm:$0xff] %v3246_v20 }
 0x426   : > { %vm3215_vm11 = vcmp.ge.f32.partialorder %v3164_v12, 0.0  ;;  %v3231_v29 = vmul.f32 0.22916667, %v3164_v12  ;;  %v3115_v45 = vadd.f32 %v4030_v11, %v6283_v14  ;;  %v4031_v56 = vpop.f32.mrb[84].mxu0 }
 0x427   : > { %v4032_v24 = vpop.f32.mrb[85].mxu0 }
 0x428   : > { %v3247_v42 = vsel %vm3215_vm11, %v3164_v12, %v3231_v29  ;;  %v3165_v51 = vadd.f32 %v3115_v45, %v6448_v26  ;;  %v4033_v22 = vadd.f32 %v4032_v24, %v4031_v56  ;;  %v6455_v26 = vld [vmem:[#allocation48_spill] sm:$0xff] }
 0x429   : > { %3263 = vst [vmem:[#allocation6 + $0x30] sm:$0xff] %v3247_v42 }
 0x42a   : > { %vm3216_vm12 = vcmp.ge.f32.partialorder %v3165_v51, 0.0  ;;  %v3232_v30 = vmul.f32 0.22916667, %v3165_v51  ;;  %v3120_v44 = vadd.f32 %v4033_v22, %v6285_v9  ;;  %v4034_v57 = vpop.f32.mrb[86].mxu0 }
 0x42b   : > { %v4035_v31 = vpop.f32.mrb[87].mxu0 }
 0x42c   : > { %v3248_v18 = vsel %vm3216_vm12, %v3165_v51, %v3232_v30  ;;  %v3166_v38 = vadd.f32 %v3120_v44, %v6449_v52  ;;  %v4036_v40 = vadd.f32 %v4035_v31, %v4034_v57 }
 0x42d   : > { %3264 = vst [vmem:[#allocation6 + $0x38] sm:$0xff] %v3248_v18 }
 0x42e   : > { %vm3217_vm13 = vcmp.ge.f32.partialorder %v3166_v38, 0.0  ;;  %v3233_v14 = vmul.f32 0.22916667, %v3166_v38  ;;  %v3125_v13 = vadd.f32 %v4036_v40, %v6287_v10  ;;  %v4037_v61 = vpop.f32.mrb[88].mxu0 }
 0x42f   : > { %v4038_v28 = vpop.f32.mrb[89].mxu0 }
 0x430   : > { %v3249_v48 = vsel %vm3217_vm13, %v3166_v38, %v3233_v14  ;;  %v3167_v33 = vadd.f32 %v3125_v13, %v6450_v53  ;;  %v4039_v19 = vadd.f32 %v4038_v28, %v4037_v61 }
 0x431   : > { %3265 = vst [vmem:[#allocation6 + $0x40] sm:$0xff] %v3249_v48 }
 0x432   : > { %vm3218_vm14 = vcmp.ge.f32.partialorder %v3167_v33, 0.0  ;;  %v3234_v9 = vmul.f32 0.22916667, %v3167_v33  ;;  %v3130_v49 = vadd.f32 %v4039_v19, %v6289_v59  ;;  %v4040_v41 = vpop.f32.mrb[90].mxu0 }
 0x433   : > { %v4041_v35 = vpop.f32.mrb[91].mxu0 }
 0x434   : > { %v3250_v63 = vsel %vm3218_vm14, %v3167_v33, %v3234_v9  ;;  %v3168_v62 = vadd.f32 %v3130_v49, %v6451_v23  ;;  %v4042_v15 = vadd.f32 %v4041_v35, %v4040_v41 }
 0x435   : > { %3266 = vst [vmem:[#allocation6 + $0x48] sm:$0xff] %v3250_v63 }
 0x436   : > { %vm3219_vm15 = vcmp.ge.f32.partialorder %v3168_v62, 0.0  ;;  %v3235_v10 = vmul.f32 0.22916667, %v3168_v62  ;;  %v3135_v32 = vadd.f32 %v4042_v15, %v6291_v6  ;;  %v4043_v47 = vpop.f32.mrb[92].mxu0 }
 0x437   : > { %v4044_v37 = vpop.f32.mrb[93].mxu0 }
 0x438   : > { %v3251_v2 = vsel %vm3219_vm15, %v3168_v62, %v3235_v10  ;;  %v3169_v46 = vadd.f32 %v3135_v32, %v6452_v3  ;;  %v4045_v0 = vadd.f32 %v4044_v37, %v4043_v47 }
 0x439   : > { %3267 = vst [vmem:[#allocation6 + $0x50] sm:$0xff] %v3251_v2 }
 0x43a   : > { %vm3220_vm0 = vcmp.ge.f32.partialorder %v3169_v46, 0.0  ;;  %v3236_v59 = vmul.f32 0.22916667, %v3169_v46  ;;  %v3140_v50 = vadd.f32 %v4045_v0, %v6293_v55  ;;  %v4046_v27 = vpop.f32.mrb[94].mxu0 }
 0x43b   : > { %v4047_v17 = vpop.f32.mrb[95].mxu0 }
 0x43c   : > { %v3252_v54 = vsel %vm3220_vm0, %v3169_v46, %v3236_v59  ;;  %v3170_v1 = vadd.f32 %v3140_v50, %v6453_v5  ;;  %v4048_v4 = vadd.f32 %v4047_v17, %v4046_v27 }
 0x43d   : > { %3268 = vst [vmem:[#allocation6 + $0x58] sm:$0xff] %v3252_v54 }
 0x43e   : > { %vm3221_vm1 = vcmp.ge.f32.partialorder %v3170_v1, 0.0  ;;  %v3237_v6 = vmul.f32 0.22916667, %v3170_v1  ;;  %v3145_v16 = vadd.f32 %v4048_v4, %v6295_v7  ;;  %v4049_v8 = vpop.f32.mrb[96].mxu0 }
 0x43f   : > { %v4050_v34 = vpop.f32.mrb[97].mxu0 }
 0x440   : > { %v3253_v36 = vsel %vm3221_vm1, %v3170_v1, %v3237_v6  ;;  %v3171_v60 = vadd.f32 %v3145_v16, %v6454_v39  ;;  %v4051_v20 = vadd.f32 %v4050_v34, %v4049_v8 }
 0x441   : > { %3269 = vst [vmem:[#allocation6 + $0x60] sm:$0xff] %v3253_v36 }
 0x442   : > { %vm3222_vm3 = vcmp.ge.f32.partialorder %v3171_v60, 0.0  ;;  %v3238_v55 = vmul.f32 0.22916667, %v3171_v60  ;;  %v3150_v21 = vadd.f32 %v4051_v20, %v6297_v25  ;;  %v4052_v12 = vpop.f32.mrb[98].mxu0 }
 0x443   : > { %v4053_v11 = vpop.f32.mrb[99].mxu0 }
 0x444   : > { %v3254_v29 = vsel %vm3222_vm3, %v3171_v60, %v3238_v55  ;;  %v3172_v45 = vadd.f32 %v3150_v21, %v5391_v58  ;;  %v4054_v56 = vadd.f32 %v4053_v11, %v4052_v12 }
 0x445   : > { %3270 = vst [vmem:[#allocation6 + $0x68] sm:$0xff] %v3254_v29 }
 0x446   : > { %vm3223_vm4 = vcmp.ge.f32.partialorder %v3172_v45, 0.0  ;;  %v3239_v7 = vmul.f32 0.22916667, %v3172_v45  ;;  %v3155_v24 = vadd.f32 %v4054_v56, %v6299_v43 }
 0x448   : > { %v3255_v42 = vsel %vm3223_vm4, %v3172_v45, %v3239_v7  ;;  %v3173_v51 = vadd.f32 %v3155_v24, %v6455_v26 }
 0x449   : > { %3271 = vst [vmem:[#allocation6 + $0x70] sm:$0xff] %v3255_v42 }
 0x44a   : > { %vm3224_vm5 = vcmp.ge.f32.partialorder %v3173_v51, 0.0  ;;  %v3240_v25 = vmul.f32 0.22916667, %v3173_v51 }
 0x44c   : > { %v3256_v58 = vsel %vm3224_vm5, %v3173_v51, %v3240_v25 }
 0x44d   : > { %3272 = vst [vmem:[#allocation6 + $0x78] sm:$0xff] %v3256_v58 }
 0x44e   : > { %4544 = shalt.err (!%p4541_p13)
}
 0x44f   : > { %s4545_s27 = scalar_lea.hbm %s6374_s7, 2048 }
 0x450   : > { %p4546_p0 = scmp.ne.s32.totalorder %s6374_s7, %s4545_s27  ;;  %p4551_p3 = scmp.lt.u32.totalorder %s4545_s27, %s6374_s7 }
 0x452   : > { %p4547_p1 = pnand %p4546_p0, %p6332_p6 }
 0x454   : > { %p4548_p2 = pneg %p4547_p1 }
 0x456   : > { %p4553_p4 = pnand %p4551_p3, %p4548_p2 }
 0x458   : > { %4556 = shalt.err (!%p4553_p4)
}
 0x459   : > { %s4592_s9 = smov 128   ;;  %s4593_s24 = smov 8  }
 0x45a   : > { %4468 = dma.vmem_to_hbm [thread:$0]  (%p6332_p6), %s3280_s15, 2048, %s6374_s7, [#allocation7], %s4592_s9, %s4592_s9, %s4593_s24  }
 0x45b   : > { %4572 = dma.done.wait (%p6332_p6), [#allocation7], 2048  }
 0x45c   : > { %4574 = vsyncadd (%p6332_p6), [#allocation7], 4294965248 }
 0x45d PF: > { %s18_s26 = sadd.s32 1, %s4585_s26   ;;  %s6457_s24 = smov %s4581_s25 }
 0x45e   : > { %p15_p5 = scmp.ge.s32.totalorder %s18_s26, 4   ;;  %s6458_s25 = smov %s6460_s28 }
 0x460   :  { %17 = sbr.rel (!%p15_p5) target bundleno = 2 (0x2), region = 134 }
 0x467   :  { %3295 = vsyncpa [#allocation7], 1 }
 0x468   :  { %3297 = vsyncpa [#allocation7 + $0x1], 1 }
 0x469   :  { %3298 = vsyncmov [#allocation5] }
 0x46c   :  { %s3299_s8 = vpop.sfrf %3298 }
 0x46d   :  { %p3737_p7 = scmp.ne.s32.totalorder %s3299_s8, 0 }
 0x46f   :  { %3303 = shalt.err (%p3737_p7)  }

</bundles_post_ra>
